<compile_context>
chip_gen: v7x
topology: tpu7x:2x2x1
jax: 0.10.0
libtpu: 0.0.40
codegen_flags: <defaults>
</compile_context>

<pallas_src>
import functools

import jax
import jax.numpy as jnp
from jax import lax
from jax.experimental import pallas as pl
from jax.experimental.pallas import tpu as pltpu


# ------------------------------ fused kernel -------------------------------

def _fused_lstm_stack_kernel(x_ref, wih_ref, whh_ref, b_ref,
                             y_ref, hn_ref, cn_ref):
    """Fused forward: sigmoid(x/10)*5 + 5 LSTM layers (crops folded into wih).

    x_ref:   (L*N, D)   f32   input, time-major rows (l-major, n-minor)
    wih_ref: (NL, D, 4H) bf16 crop-folded W_ih.T per layer (D == H here)
    whh_ref: (NL, H, 4H) bf16 W_hh.T per layer
    b_ref:   (NL, 1, 4H) f32  b_ih + b_hh per layer
    y_ref:   (L, N, H)   f32  last layer's hidden states, time-major
    hn_ref:  (NL, N, H)  f32  final hidden state per layer
    cn_ref:  (NL, N, H)  f32  final cell state per layer
    """
    L, N, H = y_ref.shape
    n_layers = wih_ref.shape[0]
    bf16 = jnp.bfloat16

    # Fused activation: sigmoid(x/10) * 5  (VPU + EUP work, stays in VMEM).
    inp = jax.nn.sigmoid(x_ref[...] * 0.1) * 5.0            # (L*N, D) f32

    for layer in range(n_layers):                            # static unroll
        wih = wih_ref[layer]                                 # (D, 4H) bf16
        whh = whh_ref[layer]                                 # (H, 4H) bf16
        bias = b_ref[layer]                                  # (1, 4H) f32

        # Hoisted input projection for ALL time steps at once (one MXU op),
        # bias folded in here so it also leaves the recurrent loop.
        gx = jnp.dot(inp.astype(bf16), wih,
                     preferred_element_type=jnp.float32) + bias  # (L*N, 4H)

        h = jnp.zeros((N, H), jnp.float32)
        c = jnp.zeros((N, H), jnp.float32)
        hs = []
        for t in range(L):                                   # fully unrolled
            gates = gx[t * N:(t + 1) * N, :] + jnp.dot(
                h.astype(bf16), whh, preferred_element_type=jnp.float32)
            # PyTorch gate order: i, f, g, o.  Elementwise math kept in f32.
            i = jax.nn.sigmoid(gates[:, 0 * H:1 * H])
            f = jax.nn.sigmoid(gates[:, 1 * H:2 * H])
            g = jnp.tanh(gates[:, 2 * H:3 * H])
            o = jax.nn.sigmoid(gates[:, 3 * H:4 * H])
            c = f * c + i * g
            h = o * jnp.tanh(c)
            hs.append(h)
            if layer == n_layers - 1:
                y_ref[t] = h                                 # (N, H) tile store
        hn_ref[layer] = h
        cn_ref[layer] = c
        if layer < n_layers - 1:
            # Next layer's input: this layer's hidden states, time-major rows.
            inp = jnp.concatenate(hs, axis=0)                # (L*N, H)


# ------------------------------- wrappers ----------------------------------

def prepare_fused_params(params):
    """Stack per-layer weights; fold crop^(l-1) into W_ih.

    crop^m(x) @ W == x @ repeat(W, 2**m, axis=0): each row of the folded
    weight is an exact copy of an original row (0/1 gather), so folding is
    numerically exact.  Matmul operands are pre-cast to bf16 (MXU-native).
    """
    wih, whh, bias = [], [], []
    for i in range(len(params)):
        p = params[f"lstm{i + 1}"]
        wih.append(jnp.repeat(p["wih_t"], 2 ** i, axis=0).astype(jnp.bfloat16))
        whh.append(p["whh_t"].astype(jnp.bfloat16))
        bias.append(p["bias"].reshape(1, -1).astype(jnp.float32))
    return jnp.stack(wih), jnp.stack(whh), jnp.stack(bias)


def simple_lstm2_forward(fused_params, x):
    """SimpleLSTM2.forward (hidden_state=None) via a single fused Pallas call."""
    wih_all, whh_all, b_all = fused_params
    B, S, D = x.shape
    N, L, H = S, B, D            # torch .view(seq, batch, -1): LSTM batch=seq, time=batch
    n_layers = wih_all.shape[0]

    # Time-major (L*N, D) rows for the kernel — the only XLA layout op left.
    x_tm = jnp.transpose(x.reshape(S, B, D), (1, 0, 2)).reshape(L * N, D)

    vm = pl.BlockSpec(memory_space=pltpu.MemorySpace.VMEM)
    y_tm, hn, cn = pl.pallas_call(
        _fused_lstm_stack_kernel,
        out_shape=(
            jax.ShapeDtypeStruct((L, N, H), jnp.float32),
            jax.ShapeDtypeStruct((n_layers, N, H), jnp.float32),
            jax.ShapeDtypeStruct((n_layers, N, H), jnp.float32),
        ),
        in_specs=[vm, vm, vm, vm],
        out_specs=(vm, vm, vm),
        compiler_params=pltpu.CompilerParams(vmem_limit_bytes=32 * 1024 * 1024),
    )(x_tm, wih_all, whh_all, b_all)

    # torch: x.contiguous().view(batch, seq, -1) on the (N, L, H) LSTM output.
    out = jnp.transpose(y_tm, (1, 0, 2)).reshape(B, S, H)
    hidden = tuple((hn[i][None], cn[i][None]) for i in range(n_layers))
    return out, hidden


# --------------------- pure-JAX reference (spec mirror) ---------------------

def _crop(x):
    # TODO(synk): the odd-width np.delete branch of SimpleLSTM2.crop is dead
    # code for power-of-two data_size and is not reproduced.
    return x[:, :, 1::2] + x[:, :, 0::2]


def _lstm_layer_ref(x_nli, wih_t, whh_t, bias):
    N = x_nli.shape[0]
    H = whh_t.shape[0]

    def step(carry, x_t):
        h, c = carry
        gates = (jnp.dot(x_t, wih_t, precision=lax.Precision.HIGHEST)
                 + jnp.dot(h, whh_t, precision=lax.Precision.HIGHEST) + bias)
        i = jax.nn.sigmoid(gates[:, :H])
        f = jax.nn.sigmoid(gates[:, H:2 * H])
        g = jnp.tanh(gates[:, 2 * H:3 * H])
        o = jax.nn.sigmoid(gates[:, 3 * H:])
        c = f * c + i * g
        h = o * jnp.tanh(c)
        return (h, c), h

    init = (jnp.zeros((N, H), jnp.float32), jnp.zeros((N, H), jnp.float32))
    (hf, cf), ys = lax.scan(step, init, jnp.transpose(x_nli, (1, 0, 2)))
    return jnp.transpose(ys, (1, 0, 2)), (hf[None], cf[None])


def simple_lstm2_forward_ref(params, x):
    B, S = x.shape[0], x.shape[1]
    x = jax.nn.sigmoid(x / 10.0) * 5.0
    x = x.reshape(S, B, -1)
    x, hs1 = _lstm_layer_ref(x, **params["lstm1"])
    x = _crop(x)
    x, hs2 = _lstm_layer_ref(x, **params["lstm2"])
    x = _crop(_crop(x))
    x, hs3 = _lstm_layer_ref(x, **params["lstm3"])
    x = _crop(_crop(_crop(x)))
    x, hs4 = _lstm_layer_ref(x, **params["lstm4"])
    x = _crop(_crop(_crop(_crop(x))))
    x, hs5 = _lstm_layer_ref(x, **params["lstm5"])
    x = x.reshape(B, S, -1)
    return x, (hs1, hs2, hs3, hs4, hs5)


def init_lstm_params(key, input_size, hidden_size):
    """Deterministic init matching nn.LSTM param shapes (U(-1/sqrt(H), 1/sqrt(H)))."""
    k1, k2, k3, k4 = jax.random.split(key, 4)
    s = 1.0 / float(hidden_size) ** 0.5
    w_ih = jax.random.uniform(k1, (4 * hidden_size, input_size), jnp.float32, -s, s)
    w_hh = jax.random.uniform(k2, (4 * hidden_size, hidden_size), jnp.float32, -s, s)
    b_ih = jax.random.uniform(k3, (4 * hidden_size,), jnp.float32, -s, s)
    b_hh = jax.random.uniform(k4, (4 * hidden_size,), jnp.float32, -s, s)
    return dict(wih_t=w_ih.T, whh_t=w_hh.T, bias=b_ih + b_hh)


# ---------------------------------- main ------------------------------------

if __name__ == "__main__":
    data_size = 128
    batch, seq = 2, 8

    key = jax.random.PRNGKey(0)
    kx, k1, k2, k3, k4, k5 = jax.random.split(key, 6)
    x = jax.random.normal(kx, (batch, seq, data_size), jnp.float32)

    in_sizes = [data_size // (2 ** i) for i in range(5)]
    pkeys = [k1, k2, k3, k4, k5]
    params = {
        f"lstm{i + 1}": init_lstm_params(pkeys[i], in_sizes[i], data_size)
        for i in range(5)
    }

    fused_params = prepare_fused_params(params)
    fwd = jax.jit(functools.partial(simple_lstm2_forward, fused_params))
    out, hidden = fwd(x)
    jax.block_until_ready(out)

    # Sanity check vs a pure-JAX f32 (HIGHEST precision) mirror of the module.
    # Tolerance accounts for single-pass bf16 MXU matmuls in the fused kernel.
    out_ref, hidden_ref = simple_lstm2_forward_ref(params, x)

    assert out.shape == (batch, seq, data_size), out.shape
    for (h, c), (hr, cr) in zip(hidden, hidden_ref):
        assert h.shape == (1, seq, data_size) and c.shape == (1, seq, data_size)
        assert jnp.allclose(h, hr, atol=2e-2, rtol=2e-2), \
            float(jnp.max(jnp.abs(h - hr)))
        assert jnp.allclose(c, cr, atol=2e-2, rtol=2e-2), \
            float(jnp.max(jnp.abs(c - cr)))
    assert jnp.allclose(out, out_ref, atol=2e-2, rtol=2e-2), \
        float(jnp.max(jnp.abs(out - out_ref)))

    print("KERNEL_OK")
</pallas_src>

<mosaic_0001>
module attributes {stable_mosaic.version = 11 : i64} {
  func.func @_fused_lstm_stack_kernel(%arg0: memref<16x128xf32, #tpu.memory_space<vmem>>, %arg1: memref<5x128x512xbf16, #tpu.memory_space<vmem>>, %arg2: memref<5x128x512xbf16, #tpu.memory_space<vmem>>, %arg3: memref<5x1x512xf32, #tpu.memory_space<vmem>>, %arg4: memref<2x8x128xf32, #tpu.memory_space<vmem>>, %arg5: memref<5x8x128xf32, #tpu.memory_space<vmem>>, %arg6: memref<5x8x128xf32, #tpu.memory_space<vmem>>) attributes {dimension_semantics = [], scalar_prefetch = 0 : i64, scratch_operands = 0 : i64, tpu.core_type = #tpu.core_type<tc>} {
    %c0 = arith.constant 0 : index
    %c0_0 = arith.constant 0 : index
    %0 = vector.load %arg0[%c0, %c0_0] : memref<16x128xf32, #tpu.memory_space<vmem>>, vector<16x128xf32>
    %cst = arith.constant 1.000000e-01 : f32
    %1 = vector.broadcast %cst : f32 to vector<16x128xf32>
    %2 = arith.mulf %0, %1 : vector<16x128xf32>
    %3 = arith.negf %2 : vector<16x128xf32>
    %4 = math.exp %3 : vector<16x128xf32>
    %cst_1 = arith.constant 1.000000e+00 : f32
    %5 = vector.broadcast %cst_1 : f32 to vector<16x128xf32>
    %6 = arith.addf %5, %4 : vector<16x128xf32>
    %7 = arith.divf %5, %6 : vector<16x128xf32>
    %cst_2 = arith.constant 5.000000e+00 : f32
    %8 = vector.broadcast %cst_2 : f32 to vector<16x128xf32>
    %9 = arith.mulf %7, %8 : vector<16x128xf32>
    %c0_3 = arith.constant 0 : index
    %c0_4 = arith.constant 0 : index
    %c0_5 = arith.constant 0 : index
    %10 = vector.load %arg1[%c0_3, %c0_4, %c0_5] : memref<5x128x512xbf16, #tpu.memory_space<vmem>>, vector<1x128x512xbf16>
    %11 = vector.shape_cast %10 : vector<1x128x512xbf16> to vector<128x512xbf16>
    %c0_6 = arith.constant 0 : index
    %c0_7 = arith.constant 0 : index
    %c0_8 = arith.constant 0 : index
    %12 = vector.load %arg2[%c0_6, %c0_7, %c0_8] : memref<5x128x512xbf16, #tpu.memory_space<vmem>>, vector<1x128x512xbf16>
    %13 = vector.shape_cast %12 : vector<1x128x512xbf16> to vector<128x512xbf16>
    %c0_9 = arith.constant 0 : index
    %c0_10 = arith.constant 0 : index
    %c0_11 = arith.constant 0 : index
    %14 = vector.load %arg3[%c0_9, %c0_10, %c0_11] : memref<5x1x512xf32, #tpu.memory_space<vmem>>, vector<1x1x512xf32>
    %15 = vector.shape_cast %14 : vector<1x1x512xf32> to vector<1x512xf32>
    %16 = arith.truncf %9 : vector<16x128xf32> to vector<16x128xbf16>
    %cst_12 = arith.constant dense<0.000000e+00> : vector<16x512xf32>
    %17 = tpu.matmul %16, %11, %cst_12 {dimension_numbers = #tpu.dot_dimension_numbers<[1], [0], [0], [1], [0, 0, 1, 1], [], []>} : vector<16x128xbf16>, vector<128x512xbf16>, vector<16x512xf32> -> vector<16x512xf32>
    %18 = vector.broadcast %15 : vector<1x512xf32> to vector<16x512xf32>
    %19 = arith.addf %17, %18 : vector<16x512xf32>
    %cst_13 = arith.constant 0.000000e+00 : f32
    %20 = vector.broadcast %cst_13 : f32 to vector<8x128xf32>
    %cst_14 = arith.constant 0.000000e+00 : f32
    %21 = vector.broadcast %cst_14 : f32 to vector<8x128xf32>
    %22 = vector.extract_strided_slice %19 {offsets = [0, 0], sizes = [8, 512], strides = [1, 1]} : vector<16x512xf32> to vector<8x512xf32>
    %23 = arith.truncf %20 : vector<8x128xf32> to vector<8x128xbf16>
    %cst_15 = arith.constant dense<0.000000e+00> : vector<8x512xf32>
    %24 = tpu.matmul %23, %13, %cst_15 {dimension_numbers = #tpu.dot_dimension_numbers<[1], [0], [0], [1], [0, 0, 1, 1], [], []>} : vector<8x128xbf16>, vector<128x512xbf16>, vector<8x512xf32> -> vector<8x512xf32>
    %25 = arith.addf %22, %24 : vector<8x512xf32>
    %26 = vector.extract_strided_slice %25 {offsets = [0, 0], sizes = [8, 128], strides = [1, 1]} : vector<8x512xf32> to vector<8x128xf32>
    %27 = arith.negf %26 : vector<8x128xf32>
    %28 = math.exp %27 : vector<8x128xf32>
    %cst_16 = arith.constant 1.000000e+00 : f32
    %29 = vector.broadcast %cst_16 : f32 to vector<8x128xf32>
    %30 = arith.addf %29, %28 : vector<8x128xf32>
    %31 = arith.divf %29, %30 : vector<8x128xf32>
    %32 = vector.extract_strided_slice %25 {offsets = [0, 128], sizes = [8, 128], strides = [1, 1]} : vector<8x512xf32> to vector<8x128xf32>
    %33 = arith.negf %32 : vector<8x128xf32>
    %34 = math.exp %33 : vector<8x128xf32>
    %cst_17 = arith.constant 1.000000e+00 : f32
    %35 = vector.broadcast %cst_17 : f32 to vector<8x128xf32>
    %36 = arith.addf %35, %34 : vector<8x128xf32>
    %37 = arith.divf %35, %36 : vector<8x128xf32>
    %38 = vector.extract_strided_slice %25 {offsets = [0, 256], sizes = [8, 128], strides = [1, 1]} : vector<8x512xf32> to vector<8x128xf32>
    %39 = math.tanh %38 : vector<8x128xf32>
    %40 = vector.extract_strided_slice %25 {offsets = [0, 384], sizes = [8, 128], strides = [1, 1]} : vector<8x512xf32> to vector<8x128xf32>
    %41 = arith.negf %40 : vector<8x128xf32>
    %42 = math.exp %41 : vector<8x128xf32>
    %cst_18 = arith.constant 1.000000e+00 : f32
    %43 = vector.broadcast %cst_18 : f32 to vector<8x128xf32>
    %44 = arith.addf %43, %42 : vector<8x128xf32>
    %45 = arith.divf %43, %44 : vector<8x128xf32>
    %46 = arith.mulf %37, %21 : vector<8x128xf32>
    %47 = arith.mulf %31, %39 : vector<8x128xf32>
    %48 = arith.addf %46, %47 : vector<8x128xf32>
    %49 = math.tanh %48 : vector<8x128xf32>
    %50 = arith.mulf %45, %49 : vector<8x128xf32>
    %51 = vector.extract_strided_slice %19 {offsets = [8, 0], sizes = [8, 512], strides = [1, 1]} : vector<16x512xf32> to vector<8x512xf32>
    %52 = arith.truncf %50 : vector<8x128xf32> to vector<8x128xbf16>
    %cst_19 = arith.constant dense<0.000000e+00> : vector<8x512xf32>
    %53 = tpu.matmul %52, %13, %cst_19 {dimension_numbers = #tpu.dot_dimension_numbers<[1], [0], [0], [1], [0, 0, 1, 1], [], []>} : vector<8x128xbf16>, vector<128x512xbf16>, vector<8x512xf32> -> vector<8x512xf32>
    %54 = arith.addf %51, %53 : vector<8x512xf32>
    %55 = vector.extract_strided_slice %54 {offsets = [0, 0], sizes = [8, 128], strides = [1, 1]} : vector<8x512xf32> to vector<8x128xf32>
    %56 = arith.negf %55 : vector<8x128xf32>
    %57 = math.exp %56 : vector<8x128xf32>
    %cst_20 = arith.constant 1.000000e+00 : f32
    %58 = vector.broadcast %cst_20 : f32 to vector<8x128xf32>
    %59 = arith.addf %58, %57 : vector<8x128xf32>
    %60 = arith.divf %58, %59 : vector<8x128xf32>
    %61 = vector.extract_strided_slice %54 {offsets = [0, 128], sizes = [8, 128], strides = [1, 1]} : vector<8x512xf32> to vector<8x128xf32>
    %62 = arith.negf %61 : vector<8x128xf32>
    %63 = math.exp %62 : vector<8x128xf32>
    %cst_21 = arith.constant 1.000000e+00 : f32
    %64 = vector.broadcast %cst_21 : f32 to vector<8x128xf32>
    %65 = arith.addf %64, %63 : vector<8x128xf32>
    %66 = arith.divf %64, %65 : vector<8x128xf32>
    %67 = vector.extract_strided_slice %54 {offsets = [0, 256], sizes = [8, 128], strides = [1, 1]} : vector<8x512xf32> to vector<8x128xf32>
    %68 = math.tanh %67 : vector<8x128xf32>
    %69 = vector.extract_strided_slice %54 {offsets = [0, 384], sizes = [8, 128], strides = [1, 1]} : vector<8x512xf32> to vector<8x128xf32>
    %70 = arith.negf %69 : vector<8x128xf32>
    %71 = math.exp %70 : vector<8x128xf32>
    %cst_22 = arith.constant 1.000000e+00 : f32
    %72 = vector.broadcast %cst_22 : f32 to vector<8x128xf32>
    %73 = arith.addf %72, %71 : vector<8x128xf32>
    %74 = arith.divf %72, %73 : vector<8x128xf32>
    %75 = arith.mulf %66, %48 : vector<8x128xf32>
    %76 = arith.mulf %60, %68 : vector<8x128xf32>
    %77 = arith.addf %75, %76 : vector<8x128xf32>
    %78 = math.tanh %77 : vector<8x128xf32>
    %79 = arith.mulf %74, %78 : vector<8x128xf32>
    %c0_23 = arith.constant 0 : index
    %c0_24 = arith.constant 0 : index
    %c0_25 = arith.constant 0 : index
    %80 = vector.load %arg5[%c0_23, %c0_24, %c0_25] : memref<5x8x128xf32, #tpu.memory_space<vmem>>, vector<1x8x128xf32>
    %81 = vector.shape_cast %80 : vector<1x8x128xf32> to vector<8x128xf32>
    %82 = vector.shape_cast %79 : vector<8x128xf32> to vector<1x8x128xf32>
    tpu.vector_store %arg5[%c0_23, %c0_24, %c0_25], %82 {strides = array<i32>} : memref<5x8x128xf32, #tpu.memory_space<vmem>>, vector<1x8x128xf32>,
    %c0_26 = arith.constant 0 : index
    %c0_27 = arith.constant 0 : index
    %c0_28 = arith.constant 0 : index
    %83 = vector.load %arg6[%c0_26, %c0_27, %c0_28] : memref<5x8x128xf32, #tpu.memory_space<vmem>>, vector<1x8x128xf32>
    %84 = vector.shape_cast %83 : vector<1x8x128xf32> to vector<8x128xf32>
    %85 = vector.shape_cast %77 : vector<8x128xf32> to vector<1x8x128xf32>
    tpu.vector_store %arg6[%c0_26, %c0_27, %c0_28], %85 {strides = array<i32>} : memref<5x8x128xf32, #tpu.memory_space<vmem>>, vector<1x8x128xf32>,
    %86 = tpu.concatenate %50, %79 in 0 : vector<8x128xf32>, vector<8x128xf32> -> vector<16x128xf32>
    %c1 = arith.constant 1 : index
    %c0_29 = arith.constant 0 : index
    %c0_30 = arith.constant 0 : index
    %87 = vector.load %arg1[%c1, %c0_29, %c0_30] : memref<5x128x512xbf16, #tpu.memory_space<vmem>>, vector<1x128x512xbf16>
    %88 = vector.shape_cast %87 : vector<1x128x512xbf16> to vector<128x512xbf16>
    %c1_31 = arith.constant 1 : index
    %c0_32 = arith.constant 0 : index
    %c0_33 = arith.constant 0 : index
    %89 = vector.load %arg2[%c1_31, %c0_32, %c0_33] : memref<5x128x512xbf16, #tpu.memory_space<vmem>>, vector<1x128x512xbf16>
    %90 = vector.shape_cast %89 : vector<1x128x512xbf16> to vector<128x512xbf16>
    %c1_34 = arith.constant 1 : index
    %c0_35 = arith.constant 0 : index
    %c0_36 = arith.constant 0 : index
    %91 = vector.load %arg3[%c1_34, %c0_35, %c0_36] : memref<5x1x512xf32, #tpu.memory_space<vmem>>, vector<1x1x512xf32>
    %92 = vector.shape_cast %91 : vector<1x1x512xf32> to vector<1x512xf32>
    %93 = arith.truncf %86 : vector<16x128xf32> to vector<16x128xbf16>
    %cst_37 = arith.constant dense<0.000000e+00> : vector<16x512xf32>
    %94 = tpu.matmul %93, %88, %cst_37 {dimension_numbers = #tpu.dot_dimension_numbers<[1], [0], [0], [1], [0, 0, 1, 1], [], []>} : vector<16x128xbf16>, vector<128x512xbf16>, vector<16x512xf32> -> vector<16x512xf32>
    %95 = vector.broadcast %92 : vector<1x512xf32> to vector<16x512xf32>
    %96 = arith.addf %94, %95 : vector<16x512xf32>
    %cst_38 = arith.constant 0.000000e+00 : f32
    %97 = vector.broadcast %cst_38 : f32 to vector<8x128xf32>
    %cst_39 = arith.constant 0.000000e+00 : f32
    %98 = vector.broadcast %cst_39 : f32 to vector<8x128xf32>
    %99 = vector.extract_strided_slice %96 {offsets = [0, 0], sizes = [8, 512], strides = [1, 1]} : vector<16x512xf32> to vector<8x512xf32>
    %100 = arith.truncf %97 : vector<8x128xf32> to vector<8x128xbf16>
    %cst_40 = arith.constant dense<0.000000e+00> : vector<8x512xf32>
    %101 = tpu.matmul %100, %90, %cst_40 {dimension_numbers = #tpu.dot_dimension_numbers<[1], [0], [0], [1], [0, 0, 1, 1], [], []>} : vector<8x128xbf16>, vector<128x512xbf16>, vector<8x512xf32> -> vector<8x512xf32>
    %102 = arith.addf %99, %101 : vector<8x512xf32>
    %103 = vector.extract_strided_slice %102 {offsets = [0, 0], sizes = [8, 128], strides = [1, 1]} : vector<8x512xf32> to vector<8x128xf32>
    %104 = arith.negf %103 : vector<8x128xf32>
    %105 = math.exp %104 : vector<8x128xf32>
    %cst_41 = arith.constant 1.000000e+00 : f32
    %106 = vector.broadcast %cst_41 : f32 to vector<8x128xf32>
    %107 = arith.addf %106, %105 : vector<8x128xf32>
    %108 = arith.divf %106, %107 : vector<8x128xf32>
    %109 = vector.extract_strided_slice %102 {offsets = [0, 128], sizes = [8, 128], strides = [1, 1]} : vector<8x512xf32> to vector<8x128xf32>
    %110 = arith.negf %109 : vector<8x128xf32>
    %111 = math.exp %110 : vector<8x128xf32>
    %cst_42 = arith.constant 1.000000e+00 : f32
    %112 = vector.broadcast %cst_42 : f32 to vector<8x128xf32>
    %113 = arith.addf %112, %111 : vector<8x128xf32>
    %114 = arith.divf %112, %113 : vector<8x128xf32>
    %115 = vector.extract_strided_slice %102 {offsets = [0, 256], sizes = [8, 128], strides = [1, 1]} : vector<8x512xf32> to vector<8x128xf32>
    %116 = math.tanh %115 : vector<8x128xf32>
    %117 = vector.extract_strided_slice %102 {offsets = [0, 384], sizes = [8, 128], strides = [1, 1]} : vector<8x512xf32> to vector<8x128xf32>
    %118 = arith.negf %117 : vector<8x128xf32>
    %119 = math.exp %118 : vector<8x128xf32>
    %cst_43 = arith.constant 1.000000e+00 : f32
    %120 = vector.broadcast %cst_43 : f32 to vector<8x128xf32>
    %121 = arith.addf %120, %119 : vector<8x128xf32>
    %122 = arith.divf %120, %121 : vector<8x128xf32>
    %123 = arith.mulf %114, %98 : vector<8x128xf32>
    %124 = arith.mulf %108, %116 : vector<8x128xf32>
    %125 = arith.addf %123, %124 : vector<8x128xf32>
    %126 = math.tanh %125 : vector<8x128xf32>
    %127 = arith.mulf %122, %126 : vector<8x128xf32>
    %128 = vector.extract_strided_slice %96 {offsets = [8, 0], sizes = [8, 512], strides = [1, 1]} : vector<16x512xf32> to vector<8x512xf32>
    %129 = arith.truncf %127 : vector<8x128xf32> to vector<8x128xbf16>
    %cst_44 = arith.constant dense<0.000000e+00> : vector<8x512xf32>
    %130 = tpu.matmul %129, %90, %cst_44 {dimension_numbers = #tpu.dot_dimension_numbers<[1], [0], [0], [1], [0, 0, 1, 1], [], []>} : vector<8x128xbf16>, vector<128x512xbf16>, vector<8x512xf32> -> vector<8x512xf32>
    %131 = arith.addf %128, %130 : vector<8x512xf32>
    %132 = vector.extract_strided_slice %131 {offsets = [0, 0], sizes = [8, 128], strides = [1, 1]} : vector<8x512xf32> to vector<8x128xf32>
    %133 = arith.negf %132 : vector<8x128xf32>
    %134 = math.exp %133 : vector<8x128xf32>
    %cst_45 = arith.constant 1.000000e+00 : f32
    %135 = vector.broadcast %cst_45 : f32 to vector<8x128xf32>
    %136 = arith.addf %135, %134 : vector<8x128xf32>
    %137 = arith.divf %135, %136 : vector<8x128xf32>
    %138 = vector.extract_strided_slice %131 {offsets = [0, 128], sizes = [8, 128], strides = [1, 1]} : vector<8x512xf32> to vector<8x128xf32>
    %139 = arith.negf %138 : vector<8x128xf32>
    %140 = math.exp %139 : vector<8x128xf32>
    %cst_46 = arith.constant 1.000000e+00 : f32
    %141 = vector.broadcast %cst_46 : f32 to vector<8x128xf32>
    %142 = arith.addf %141, %140 : vector<8x128xf32>
    %143 = arith.divf %141, %142 : vector<8x128xf32>
    %144 = vector.extract_strided_slice %131 {offsets = [0, 256], sizes = [8, 128], strides = [1, 1]} : vector<8x512xf32> to vector<8x128xf32>
    %145 = math.tanh %144 : vector<8x128xf32>
    %146 = vector.extract_strided_slice %131 {offsets = [0, 384], sizes = [8, 128], strides = [1, 1]} : vector<8x512xf32> to vector<8x128xf32>
    %147 = arith.negf %146 : vector<8x128xf32>
    %148 = math.exp %147 : vector<8x128xf32>
    %cst_47 = arith.constant 1.000000e+00 : f32
    %149 = vector.broadcast %cst_47 : f32 to vector<8x128xf32>
    %150 = arith.addf %149, %148 : vector<8x128xf32>
    %151 = arith.divf %149, %150 : vector<8x128xf32>
    %152 = arith.mulf %143, %125 : vector<8x128xf32>
    %153 = arith.mulf %137, %145 : vector<8x128xf32>
    %154 = arith.addf %152, %153 : vector<8x128xf32>
    %155 = math.tanh %154 : vector<8x128xf32>
    %156 = arith.mulf %151, %155 : vector<8x128xf32>
    %c1_48 = arith.constant 1 : index
    %c0_49 = arith.constant 0 : index
    %c0_50 = arith.constant 0 : index
    %157 = vector.load %arg5[%c1_48, %c0_49, %c0_50] : memref<5x8x128xf32, #tpu.memory_space<vmem>>, vector<1x8x128xf32>
    %158 = vector.shape_cast %157 : vector<1x8x128xf32> to vector<8x128xf32>
    %159 = vector.shape_cast %156 : vector<8x128xf32> to vector<1x8x128xf32>
    tpu.vector_store %arg5[%c1_48, %c0_49, %c0_50], %159 {strides = array<i32>} : memref<5x8x128xf32, #tpu.memory_space<vmem>>, vector<1x8x128xf32>,
    %c1_51 = arith.constant 1 : index
    %c0_52 = arith.constant 0 : index
    %c0_53 = arith.constant 0 : index
    %160 = vector.load %arg6[%c1_51, %c0_52, %c0_53] : memref<5x8x128xf32, #tpu.memory_space<vmem>>, vector<1x8x128xf32>
    %161 = vector.shape_cast %160 : vector<1x8x128xf32> to vector<8x128xf32>
    %162 = vector.shape_cast %154 : vector<8x128xf32> to vector<1x8x128xf32>
    tpu.vector_store %arg6[%c1_51, %c0_52, %c0_53], %162 {strides = array<i32>} : memref<5x8x128xf32, #tpu.memory_space<vmem>>, vector<1x8x128xf32>,
    %163 = tpu.concatenate %127, %156 in 0 : vector<8x128xf32>, vector<8x128xf32> -> vector<16x128xf32>
    %c2 = arith.constant 2 : index
    %c0_54 = arith.constant 0 : index
    %c0_55 = arith.constant 0 : index
    %164 = vector.load %arg1[%c2, %c0_54, %c0_55] : memref<5x128x512xbf16, #tpu.memory_space<vmem>>, vector<1x128x512xbf16>
    %165 = vector.shape_cast %164 : vector<1x128x512xbf16> to vector<128x512xbf16>
    %c2_56 = arith.constant 2 : index
    %c0_57 = arith.constant 0 : index
    %c0_58 = arith.constant 0 : index
    %166 = vector.load %arg2[%c2_56, %c0_57, %c0_58] : memref<5x128x512xbf16, #tpu.memory_space<vmem>>, vector<1x128x512xbf16>
    %167 = vector.shape_cast %166 : vector<1x128x512xbf16> to vector<128x512xbf16>
    %c2_59 = arith.constant 2 : index
    %c0_60 = arith.constant 0 : index
    %c0_61 = arith.constant 0 : index
    %168 = vector.load %arg3[%c2_59, %c0_60, %c0_61] : memref<5x1x512xf32, #tpu.memory_space<vmem>>, vector<1x1x512xf32>
    %169 = vector.shape_cast %168 : vector<1x1x512xf32> to vector<1x512xf32>
    %170 = arith.truncf %163 : vector<16x128xf32> to vector<16x128xbf16>
    %cst_62 = arith.constant dense<0.000000e+00> : vector<16x512xf32>
    %171 = tpu.matmul %170, %165, %cst_62 {dimension_numbers = #tpu.dot_dimension_numbers<[1], [0], [0], [1], [0, 0, 1, 1], [], []>} : vector<16x128xbf16>, vector<128x512xbf16>, vector<16x512xf32> -> vector<16x512xf32>
    %172 = vector.broadcast %169 : vector<1x512xf32> to vector<16x512xf32>
    %173 = arith.addf %171, %172 : vector<16x512xf32>
    %cst_63 = arith.constant 0.000000e+00 : f32
    %174 = vector.broadcast %cst_63 : f32 to vector<8x128xf32>
    %cst_64 = arith.constant 0.000000e+00 : f32
    %175 = vector.broadcast %cst_64 : f32 to vector<8x128xf32>
    %176 = vector.extract_strided_slice %173 {offsets = [0, 0], sizes = [8, 512], strides = [1, 1]} : vector<16x512xf32> to vector<8x512xf32>
    %177 = arith.truncf %174 : vector<8x128xf32> to vector<8x128xbf16>
    %cst_65 = arith.constant dense<0.000000e+00> : vector<8x512xf32>
    %178 = tpu.matmul %177, %167, %cst_65 {dimension_numbers = #tpu.dot_dimension_numbers<[1], [0], [0], [1], [0, 0, 1, 1], [], []>} : vector<8x128xbf16>, vector<128x512xbf16>, vector<8x512xf32> -> vector<8x512xf32>
    %179 = arith.addf %176, %178 : vector<8x512xf32>
    %180 = vector.extract_strided_slice %179 {offsets = [0, 0], sizes = [8, 128], strides = [1, 1]} : vector<8x512xf32> to vector<8x128xf32>
    %181 = arith.negf %180 : vector<8x128xf32>
    %182 = math.exp %181 : vector<8x128xf32>
    %cst_66 = arith.constant 1.000000e+00 : f32
    %183 = vector.broadcast %cst_66 : f32 to vector<8x128xf32>
    %184 = arith.addf %183, %182 : vector<8x128xf32>
    %185 = arith.divf %183, %184 : vector<8x128xf32>
    %186 = vector.extract_strided_slice %179 {offsets = [0, 128], sizes = [8, 128], strides = [1, 1]} : vector<8x512xf32> to vector<8x128xf32>
    %187 = arith.negf %186 : vector<8x128xf32>
    %188 = math.exp %187 : vector<8x128xf32>
    %cst_67 = arith.constant 1.000000e+00 : f32
    %189 = vector.broadcast %cst_67 : f32 to vector<8x128xf32>
    %190 = arith.addf %189, %188 : vector<8x128xf32>
    %191 = arith.divf %189, %190 : vector<8x128xf32>
    %192 = vector.extract_strided_slice %179 {offsets = [0, 256], sizes = [8, 128], strides = [1, 1]} : vector<8x512xf32> to vector<8x128xf32>
    %193 = math.tanh %192 : vector<8x128xf32>
    %194 = vector.extract_strided_slice %179 {offsets = [0, 384], sizes = [8, 128], strides = [1, 1]} : vector<8x512xf32> to vector<8x128xf32>
    %195 = arith.negf %194 : vector<8x128xf32>
    %196 = math.exp %195 : vector<8x128xf32>
    %cst_68 = arith.constant 1.000000e+00 : f32
    %197 = vector.broadcast %cst_68 : f32 to vector<8x128xf32>
    %198 = arith.addf %197, %196 : vector<8x128xf32>
    %199 = arith.divf %197, %198 : vector<8x128xf32>
    %200 = arith.mulf %191, %175 : vector<8x128xf32>
    %201 = arith.mulf %185, %193 : vector<8x128xf32>
    %202 = arith.addf %200, %201 : vector<8x128xf32>
    %203 = math.tanh %202 : vector<8x128xf32>
    %204 = arith.mulf %199, %203 : vector<8x128xf32>
    %205 = vector.extract_strided_slice %173 {offsets = [8, 0], sizes = [8, 512], strides = [1, 1]} : vector<16x512xf32> to vector<8x512xf32>
    %206 = arith.truncf %204 : vector<8x128xf32> to vector<8x128xbf16>
    %cst_69 = arith.constant dense<0.000000e+00> : vector<8x512xf32>
    %207 = tpu.matmul %206, %167, %cst_69 {dimension_numbers = #tpu.dot_dimension_numbers<[1], [0], [0], [1], [0, 0, 1, 1], [], []>} : vector<8x128xbf16>, vector<128x512xbf16>, vector<8x512xf32> -> vector<8x512xf32>
    %208 = arith.addf %205, %207 : vector<8x512xf32>
    %209 = vector.extract_strided_slice %208 {offsets = [0, 0], sizes = [8, 128], strides = [1, 1]} : vector<8x512xf32> to vector<8x128xf32>
    %210 = arith.negf %209 : vector<8x128xf32>
    %211 = math.exp %210 : vector<8x128xf32>
    %cst_70 = arith.constant 1.000000e+00 : f32
    %212 = vector.broadcast %cst_70 : f32 to vector<8x128xf32>
    %213 = arith.addf %212, %211 : vector<8x128xf32>
    %214 = arith.divf %212, %213 : vector<8x128xf32>
    %215 = vector.extract_strided_slice %208 {offsets = [0, 128], sizes = [8, 128], strides = [1, 1]} : vector<8x512xf32> to vector<8x128xf32>
    %216 = arith.negf %215 : vector<8x128xf32>
    %217 = math.exp %216 : vector<8x128xf32>
    %cst_71 = arith.constant 1.000000e+00 : f32
    %218 = vector.broadcast %cst_71 : f32 to vector<8x128xf32>
    %219 = arith.addf %218, %217 : vector<8x128xf32>
    %220 = arith.divf %218, %219 : vector<8x128xf32>
    %221 = vector.extract_strided_slice %208 {offsets = [0, 256], sizes = [8, 128], strides = [1, 1]} : vector<8x512xf32> to vector<8x128xf32>
    %222 = math.tanh %221 : vector<8x128xf32>
    %223 = vector.extract_strided_slice %208 {offsets = [0, 384], sizes = [8, 128], strides = [1, 1]} : vector<8x512xf32> to vector<8x128xf32>
    %224 = arith.negf %223 : vector<8x128xf32>
    %225 = math.exp %224 : vector<8x128xf32>
    %cst_72 = arith.constant 1.000000e+00 : f32
    %226 = vector.broadcast %cst_72 : f32 to vector<8x128xf32>
    %227 = arith.addf %226, %225 : vector<8x128xf32>
    %228 = arith.divf %226, %227 : vector<8x128xf32>
    %229 = arith.mulf %220, %202 : vector<8x128xf32>
    %230 = arith.mulf %214, %222 : vector<8x128xf32>
    %231 = arith.addf %229, %230 : vector<8x128xf32>
    %232 = math.tanh %231 : vector<8x128xf32>
    %233 = arith.mulf %228, %232 : vector<8x128xf32>
    %c2_73 = arith.constant 2 : index
    %c0_74 = arith.constant 0 : index
    %c0_75 = arith.constant 0 : index
    %234 = vector.load %arg5[%c2_73, %c0_74, %c0_75] : memref<5x8x128xf32, #tpu.memory_space<vmem>>, vector<1x8x128xf32>
    %235 = vector.shape_cast %234 : vector<1x8x128xf32> to vector<8x128xf32>
    %236 = vector.shape_cast %233 : vector<8x128xf32> to vector<1x8x128xf32>
    tpu.vector_store %arg5[%c2_73, %c0_74, %c0_75], %236 {strides = array<i32>} : memref<5x8x128xf32, #tpu.memory_space<vmem>>, vector<1x8x128xf32>,
    %c2_76 = arith.constant 2 : index
    %c0_77 = arith.constant 0 : index
    %c0_78 = arith.constant 0 : index
    %237 = vector.load %arg6[%c2_76, %c0_77, %c0_78] : memref<5x8x128xf32, #tpu.memory_space<vmem>>, vector<1x8x128xf32>
    %238 = vector.shape_cast %237 : vector<1x8x128xf32> to vector<8x128xf32>
    %239 = vector.shape_cast %231 : vector<8x128xf32> to vector<1x8x128xf32>
    tpu.vector_store %arg6[%c2_76, %c0_77, %c0_78], %239 {strides = array<i32>} : memref<5x8x128xf32, #tpu.memory_space<vmem>>, vector<1x8x128xf32>,
    %240 = tpu.concatenate %204, %233 in 0 : vector<8x128xf32>, vector<8x128xf32> -> vector<16x128xf32>
    %c3 = arith.constant 3 : index
    %c0_79 = arith.constant 0 : index
    %c0_80 = arith.constant 0 : index
    %241 = vector.load %arg1[%c3, %c0_79, %c0_80] : memref<5x128x512xbf16, #tpu.memory_space<vmem>>, vector<1x128x512xbf16>
    %242 = vector.shape_cast %241 : vector<1x128x512xbf16> to vector<128x512xbf16>
    %c3_81 = arith.constant 3 : index
    %c0_82 = arith.constant 0 : index
    %c0_83 = arith.constant 0 : index
    %243 = vector.load %arg2[%c3_81, %c0_82, %c0_83] : memref<5x128x512xbf16, #tpu.memory_space<vmem>>, vector<1x128x512xbf16>
    %244 = vector.shape_cast %243 : vector<1x128x512xbf16> to vector<128x512xbf16>
    %c3_84 = arith.constant 3 : index
    %c0_85 = arith.constant 0 : index
    %c0_86 = arith.constant 0 : index
    %245 = vector.load %arg3[%c3_84, %c0_85, %c0_86] : memref<5x1x512xf32, #tpu.memory_space<vmem>>, vector<1x1x512xf32>
    %246 = vector.shape_cast %245 : vector<1x1x512xf32> to vector<1x512xf32>
    %247 = arith.truncf %240 : vector<16x128xf32> to vector<16x128xbf16>
    %cst_87 = arith.constant dense<0.000000e+00> : vector<16x512xf32>
    %248 = tpu.matmul %247, %242, %cst_87 {dimension_numbers = #tpu.dot_dimension_numbers<[1], [0], [0], [1], [0, 0, 1, 1], [], []>} : vector<16x128xbf16>, vector<128x512xbf16>, vector<16x512xf32> -> vector<16x512xf32>
    %249 = vector.broadcast %246 : vector<1x512xf32> to vector<16x512xf32>
    %250 = arith.addf %248, %249 : vector<16x512xf32>
    %cst_88 = arith.constant 0.000000e+00 : f32
    %251 = vector.broadcast %cst_88 : f32 to vector<8x128xf32>
    %cst_89 = arith.constant 0.000000e+00 : f32
    %252 = vector.broadcast %cst_89 : f32 to vector<8x128xf32>
    %253 = vector.extract_strided_slice %250 {offsets = [0, 0], sizes = [8, 512], strides = [1, 1]} : vector<16x512xf32> to vector<8x512xf32>
    %254 = arith.truncf %251 : vector<8x128xf32> to vector<8x128xbf16>
    %cst_90 = arith.constant dense<0.000000e+00> : vector<8x512xf32>
    %255 = tpu.matmul %254, %244, %cst_90 {dimension_numbers = #tpu.dot_dimension_numbers<[1], [0], [0], [1], [0, 0, 1, 1], [], []>} : vector<8x128xbf16>, vector<128x512xbf16>, vector<8x512xf32> -> vector<8x512xf32>
    %256 = arith.addf %253, %255 : vector<8x512xf32>
    %257 = vector.extract_strided_slice %256 {offsets = [0, 0], sizes = [8, 128], strides = [1, 1]} : vector<8x512xf32> to vector<8x128xf32>
    %258 = arith.negf %257 : vector<8x128xf32>
    %259 = math.exp %258 : vector<8x128xf32>
    %cst_91 = arith.constant 1.000000e+00 : f32
    %260 = vector.broadcast %cst_91 : f32 to vector<8x128xf32>
    %261 = arith.addf %260, %259 : vector<8x128xf32>
    %262 = arith.divf %260, %261 : vector<8x128xf32>
    %263 = vector.extract_strided_slice %256 {offsets = [0, 128], sizes = [8, 128], strides = [1, 1]} : vector<8x512xf32> to vector<8x128xf32>
    %264 = arith.negf %263 : vector<8x128xf32>
    %265 = math.exp %264 : vector<8x128xf32>
    %cst_92 = arith.constant 1.000000e+00 : f32
    %266 = vector.broadcast %cst_92 : f32 to vector<8x128xf32>
    %267 = arith.addf %266, %265 : vector<8x128xf32>
    %268 = arith.divf %266, %267 : vector<8x128xf32>
    %269 = vector.extract_strided_slice %256 {offsets = [0, 256], sizes = [8, 128], strides = [1, 1]} : vector<8x512xf32> to vector<8x128xf32>
    %270 = math.tanh %269 : vector<8x128xf32>
    %271 = vector.extract_strided_slice %256 {offsets = [0, 384], sizes = [8, 128], strides = [1, 1]} : vector<8x512xf32> to vector<8x128xf32>
    %272 = arith.negf %271 : vector<8x128xf32>
    %273 = math.exp %272 : vector<8x128xf32>
    %cst_93 = arith.constant 1.000000e+00 : f32
    %274 = vector.broadcast %cst_93 : f32 to vector<8x128xf32>
    %275 = arith.addf %274, %273 : vector<8x128xf32>
    %276 = arith.divf %274, %275 : vector<8x128xf32>
    %277 = arith.mulf %268, %252 : vector<8x128xf32>
    %278 = arith.mulf %262, %270 : vector<8x128xf32>
    %279 = arith.addf %277, %278 : vector<8x128xf32>
    %280 = math.tanh %279 : vector<8x128xf32>
    %281 = arith.mulf %276, %280 : vector<8x128xf32>
    %282 = vector.extract_strided_slice %250 {offsets = [8, 0], sizes = [8, 512], strides = [1, 1]} : vector<16x512xf32> to vector<8x512xf32>
    %283 = arith.truncf %281 : vector<8x128xf32> to vector<8x128xbf16>
    %cst_94 = arith.constant dense<0.000000e+00> : vector<8x512xf32>
    %284 = tpu.matmul %283, %244, %cst_94 {dimension_numbers = #tpu.dot_dimension_numbers<[1], [0], [0], [1], [0, 0, 1, 1], [], []>} : vector<8x128xbf16>, vector<128x512xbf16>, vector<8x512xf32> -> vector<8x512xf32>
    %285 = arith.addf %282, %284 : vector<8x512xf32>
    %286 = vector.extract_strided_slice %285 {offsets = [0, 0], sizes = [8, 128], strides = [1, 1]} : vector<8x512xf32> to vector<8x128xf32>
    %287 = arith.negf %286 : vector<8x128xf32>
    %288 = math.exp %287 : vector<8x128xf32>
    %cst_95 = arith.constant 1.000000e+00 : f32
    %289 = vector.broadcast %cst_95 : f32 to vector<8x128xf32>
    %290 = arith.addf %289, %288 : vector<8x128xf32>
    %291 = arith.divf %289, %290 : vector<8x128xf32>
    %292 = vector.extract_strided_slice %285 {offsets = [0, 128], sizes = [8, 128], strides = [1, 1]} : vector<8x512xf32> to vector<8x128xf32>
    %293 = arith.negf %292 : vector<8x128xf32>
    %294 = math.exp %293 : vector<8x128xf32>
    %cst_96 = arith.constant 1.000000e+00 : f32
    %295 = vector.broadcast %cst_96 : f32 to vector<8x128xf32>
    %296 = arith.addf %295, %294 : vector<8x128xf32>
    %297 = arith.divf %295, %296 : vector<8x128xf32>
    %298 = vector.extract_strided_slice %285 {offsets = [0, 256], sizes = [8, 128], strides = [1, 1]} : vector<8x512xf32> to vector<8x128xf32>
    %299 = math.tanh %298 : vector<8x128xf32>
    %300 = vector.extract_strided_slice %285 {offsets = [0, 384], sizes = [8, 128], strides = [1, 1]} : vector<8x512xf32> to vector<8x128xf32>
    %301 = arith.negf %300 : vector<8x128xf32>
    %302 = math.exp %301 : vector<8x128xf32>
    %cst_97 = arith.constant 1.000000e+00 : f32
    %303 = vector.broadcast %cst_97 : f32 to vector<8x128xf32>
    %304 = arith.addf %303, %302 : vector<8x128xf32>
    %305 = arith.divf %303, %304 : vector<8x128xf32>
    %306 = arith.mulf %297, %279 : vector<8x128xf32>
    %307 = arith.mulf %291, %299 : vector<8x128xf32>
    %308 = arith.addf %306, %307 : vector<8x128xf32>
    %309 = math.tanh %308 : vector<8x128xf32>
    %310 = arith.mulf %305, %309 : vector<8x128xf32>
    %c3_98 = arith.constant 3 : index
    %c0_99 = arith.constant 0 : index
    %c0_100 = arith.constant 0 : index
    %311 = vector.load %arg5[%c3_98, %c0_99, %c0_100] : memref<5x8x128xf32, #tpu.memory_space<vmem>>, vector<1x8x128xf32>
    %312 = vector.shape_cast %311 : vector<1x8x128xf32> to vector<8x128xf32>
    %313 = vector.shape_cast %310 : vector<8x128xf32> to vector<1x8x128xf32>
    tpu.vector_store %arg5[%c3_98, %c0_99, %c0_100], %313 {strides = array<i32>} : memref<5x8x128xf32, #tpu.memory_space<vmem>>, vector<1x8x128xf32>,
    %c3_101 = arith.constant 3 : index
    %c0_102 = arith.constant 0 : index
    %c0_103 = arith.constant 0 : index
    %314 = vector.load %arg6[%c3_101, %c0_102, %c0_103] : memref<5x8x128xf32, #tpu.memory_space<vmem>>, vector<1x8x128xf32>
    %315 = vector.shape_cast %314 : vector<1x8x128xf32> to vector<8x128xf32>
    %316 = vector.shape_cast %308 : vector<8x128xf32> to vector<1x8x128xf32>
    tpu.vector_store %arg6[%c3_101, %c0_102, %c0_103], %316 {strides = array<i32>} : memref<5x8x128xf32, #tpu.memory_space<vmem>>, vector<1x8x128xf32>,
    %317 = tpu.concatenate %281, %310 in 0 : vector<8x128xf32>, vector<8x128xf32> -> vector<16x128xf32>
    %c4 = arith.constant 4 : index
    %c0_104 = arith.constant 0 : index
    %c0_105 = arith.constant 0 : index
    %318 = vector.load %arg1[%c4, %c0_104, %c0_105] : memref<5x128x512xbf16, #tpu.memory_space<vmem>>, vector<1x128x512xbf16>
    %319 = vector.shape_cast %318 : vector<1x128x512xbf16> to vector<128x512xbf16>
    %c4_106 = arith.constant 4 : index
    %c0_107 = arith.constant 0 : index
    %c0_108 = arith.constant 0 : index
    %320 = vector.load %arg2[%c4_106, %c0_107, %c0_108] : memref<5x128x512xbf16, #tpu.memory_space<vmem>>, vector<1x128x512xbf16>
    %321 = vector.shape_cast %320 : vector<1x128x512xbf16> to vector<128x512xbf16>
    %c4_109 = arith.constant 4 : index
    %c0_110 = arith.constant 0 : index
    %c0_111 = arith.constant 0 : index
    %322 = vector.load %arg3[%c4_109, %c0_110, %c0_111] : memref<5x1x512xf32, #tpu.memory_space<vmem>>, vector<1x1x512xf32>
    %323 = vector.shape_cast %322 : vector<1x1x512xf32> to vector<1x512xf32>
    %324 = arith.truncf %317 : vector<16x128xf32> to vector<16x128xbf16>
    %cst_112 = arith.constant dense<0.000000e+00> : vector<16x512xf32>
    %325 = tpu.matmul %324, %319, %cst_112 {dimension_numbers = #tpu.dot_dimension_numbers<[1], [0], [0], [1], [0, 0, 1, 1], [], []>} : vector<16x128xbf16>, vector<128x512xbf16>, vector<16x512xf32> -> vector<16x512xf32>
    %326 = vector.broadcast %323 : vector<1x512xf32> to vector<16x512xf32>
    %327 = arith.addf %325, %326 : vector<16x512xf32>
    %cst_113 = arith.constant 0.000000e+00 : f32
    %328 = vector.broadcast %cst_113 : f32 to vector<8x128xf32>
    %cst_114 = arith.constant 0.000000e+00 : f32
    %329 = vector.broadcast %cst_114 : f32 to vector<8x128xf32>
    %330 = vector.extract_strided_slice %327 {offsets = [0, 0], sizes = [8, 512], strides = [1, 1]} : vector<16x512xf32> to vector<8x512xf32>
    %331 = arith.truncf %328 : vector<8x128xf32> to vector<8x128xbf16>
    %cst_115 = arith.constant dense<0.000000e+00> : vector<8x512xf32>
    %332 = tpu.matmul %331, %321, %cst_115 {dimension_numbers = #tpu.dot_dimension_numbers<[1], [0], [0], [1], [0, 0, 1, 1], [], []>} : vector<8x128xbf16>, vector<128x512xbf16>, vector<8x512xf32> -> vector<8x512xf32>
    %333 = arith.addf %330, %332 : vector<8x512xf32>
    %334 = vector.extract_strided_slice %333 {offsets = [0, 0], sizes = [8, 128], strides = [1, 1]} : vector<8x512xf32> to vector<8x128xf32>
    %335 = arith.negf %334 : vector<8x128xf32>
    %336 = math.exp %335 : vector<8x128xf32>
    %cst_116 = arith.constant 1.000000e+00 : f32
    %337 = vector.broadcast %cst_116 : f32 to vector<8x128xf32>
    %338 = arith.addf %337, %336 : vector<8x128xf32>
    %339 = arith.divf %337, %338 : vector<8x128xf32>
    %340 = vector.extract_strided_slice %333 {offsets = [0, 128], sizes = [8, 128], strides = [1, 1]} : vector<8x512xf32> to vector<8x128xf32>
    %341 = arith.negf %340 : vector<8x128xf32>
    %342 = math.exp %341 : vector<8x128xf32>
    %cst_117 = arith.constant 1.000000e+00 : f32
    %343 = vector.broadcast %cst_117 : f32 to vector<8x128xf32>
    %344 = arith.addf %343, %342 : vector<8x128xf32>
    %345 = arith.divf %343, %344 : vector<8x128xf32>
    %346 = vector.extract_strided_slice %333 {offsets = [0, 256], sizes = [8, 128], strides = [1, 1]} : vector<8x512xf32> to vector<8x128xf32>
    %347 = math.tanh %346 : vector<8x128xf32>
    %348 = vector.extract_strided_slice %333 {offsets = [0, 384], sizes = [8, 128], strides = [1, 1]} : vector<8x512xf32> to vector<8x128xf32>
    %349 = arith.negf %348 : vector<8x128xf32>
    %350 = math.exp %349 : vector<8x128xf32>
    %cst_118 = arith.constant 1.000000e+00 : f32
    %351 = vector.broadcast %cst_118 : f32 to vector<8x128xf32>
    %352 = arith.addf %351, %350 : vector<8x128xf32>
    %353 = arith.divf %351, %352 : vector<8x128xf32>
    %354 = arith.mulf %345, %329 : vector<8x128xf32>
    %355 = arith.mulf %339, %347 : vector<8x128xf32>
    %356 = arith.addf %354, %355 : vector<8x128xf32>
    %357 = math.tanh %356 : vector<8x128xf32>
    %358 = arith.mulf %353, %357 : vector<8x128xf32>
    %c0_119 = arith.constant 0 : index
    %c0_120 = arith.constant 0 : index
    %c0_121 = arith.constant 0 : index
    %359 = vector.load %arg4[%c0_119, %c0_120, %c0_121] : memref<2x8x128xf32, #tpu.memory_space<vmem>>, vector<1x8x128xf32>
    %360 = vector.shape_cast %359 : vector<1x8x128xf32> to vector<8x128xf32>
    %361 = vector.shape_cast %358 : vector<8x128xf32> to vector<1x8x128xf32>
    tpu.vector_store %arg4[%c0_119, %c0_120, %c0_121], %361 {strides = array<i32>} : memref<2x8x128xf32, #tpu.memory_space<vmem>>, vector<1x8x128xf32>,
    %362 = vector.extract_strided_slice %327 {offsets = [8, 0], sizes = [8, 512], strides = [1, 1]} : vector<16x512xf32> to vector<8x512xf32>
    %363 = arith.truncf %358 : vector<8x128xf32> to vector<8x128xbf16>
    %cst_122 = arith.constant dense<0.000000e+00> : vector<8x512xf32>
    %364 = tpu.matmul %363, %321, %cst_122 {dimension_numbers = #tpu.dot_dimension_numbers<[1], [0], [0], [1], [0, 0, 1, 1], [], []>} : vector<8x128xbf16>, vector<128x512xbf16>, vector<8x512xf32> -> vector<8x512xf32>
    %365 = arith.addf %362, %364 : vector<8x512xf32>
    %366 = vector.extract_strided_slice %365 {offsets = [0, 0], sizes = [8, 128], strides = [1, 1]} : vector<8x512xf32> to vector<8x128xf32>
    %367 = arith.negf %366 : vector<8x128xf32>
    %368 = math.exp %367 : vector<8x128xf32>
    %cst_123 = arith.constant 1.000000e+00 : f32
    %369 = vector.broadcast %cst_123 : f32 to vector<8x128xf32>
    %370 = arith.addf %369, %368 : vector<8x128xf32>
    %371 = arith.divf %369, %370 : vector<8x128xf32>
    %372 = vector.extract_strided_slice %365 {offsets = [0, 128], sizes = [8, 128], strides = [1, 1]} : vector<8x512xf32> to vector<8x128xf32>
    %373 = arith.negf %372 : vector<8x128xf32>
    %374 = math.exp %373 : vector<8x128xf32>
    %cst_124 = arith.constant 1.000000e+00 : f32
    %375 = vector.broadcast %cst_124 : f32 to vector<8x128xf32>
    %376 = arith.addf %375, %374 : vector<8x128xf32>
    %377 = arith.divf %375, %376 : vector<8x128xf32>
    %378 = vector.extract_strided_slice %365 {offsets = [0, 256], sizes = [8, 128], strides = [1, 1]} : vector<8x512xf32> to vector<8x128xf32>
    %379 = math.tanh %378 : vector<8x128xf32>
    %380 = vector.extract_strided_slice %365 {offsets = [0, 384], sizes = [8, 128], strides = [1, 1]} : vector<8x512xf32> to vector<8x128xf32>
    %381 = arith.negf %380 : vector<8x128xf32>
    %382 = math.exp %381 : vector<8x128xf32>
    %cst_125 = arith.constant 1.000000e+00 : f32
    %383 = vector.broadcast %cst_125 : f32 to vector<8x128xf32>
    %384 = arith.addf %383, %382 : vector<8x128xf32>
    %385 = arith.divf %383, %384 : vector<8x128xf32>
    %386 = arith.mulf %377, %356 : vector<8x128xf32>
    %387 = arith.mulf %371, %379 : vector<8x128xf32>
    %388 = arith.addf %386, %387 : vector<8x128xf32>
    %389 = math.tanh %388 : vector<8x128xf32>
    %390 = arith.mulf %385, %389 : vector<8x128xf32>
    %c1_126 = arith.constant 1 : index
    %c0_127 = arith.constant 0 : index
    %c0_128 = arith.constant 0 : index
    %391 = vector.load %arg4[%c1_126, %c0_127, %c0_128] : memref<2x8x128xf32, #tpu.memory_space<vmem>>, vector<1x8x128xf32>
    %392 = vector.shape_cast %391 : vector<1x8x128xf32> to vector<8x128xf32>
    %393 = vector.shape_cast %390 : vector<8x128xf32> to vector<1x8x128xf32>
    tpu.vector_store %arg4[%c1_126, %c0_127, %c0_128], %393 {strides = array<i32>} : memref<2x8x128xf32, #tpu.memory_space<vmem>>, vector<1x8x128xf32>,
    %c4_129 = arith.constant 4 : index
    %c0_130 = arith.constant 0 : index
    %c0_131 = arith.constant 0 : index
    %394 = vector.load %arg5[%c4_129, %c0_130, %c0_131] : memref<5x8x128xf32, #tpu.memory_space<vmem>>, vector<1x8x128xf32>
    %395 = vector.shape_cast %394 : vector<1x8x128xf32> to vector<8x128xf32>
    %396 = vector.shape_cast %390 : vector<8x128xf32> to vector<1x8x128xf32>
    tpu.vector_store %arg5[%c4_129, %c0_130, %c0_131], %396 {strides = array<i32>} : memref<5x8x128xf32, #tpu.memory_space<vmem>>, vector<1x8x128xf32>,
    %c4_132 = arith.constant 4 : index
    %c0_133 = arith.constant 0 : index
    %c0_134 = arith.constant 0 : index
    %397 = vector.load %arg6[%c4_132, %c0_133, %c0_134] : memref<5x8x128xf32, #tpu.memory_space<vmem>>, vector<1x8x128xf32>
    %398 = vector.shape_cast %397 : vector<1x8x128xf32> to vector<8x128xf32>
    %399 = vector.shape_cast %388 : vector<8x128xf32> to vector<1x8x128xf32>
    tpu.vector_store %arg6[%c4_132, %c0_133, %c0_134], %399 {strides = array<i32>} : memref<5x8x128xf32, #tpu.memory_space<vmem>>, vector<1x8x128xf32>,
    return
  }
}

</mosaic_0001>

<bundles_post_ra>
// kernel: simple_lstm2_forward.1
= control target key start
LH: loop header
LB: loop body
LE: loop exit
PB: predicated region body
PF: predicated region fallthrough
CT: control target
= control target key end

     0   :  { %v4924_v1 = vmov 0   ;;  %s6337_s1 = inlined_call_operand.vmem [shape: bf16[5,128,512], index: 1, kind: input, shape index: {}]   ;;  %s6338_s0 = inlined_call_operand.vmem [shape: f32[16,128], index: 0, kind: input, shape index: {}]   ;;  %s6339_s2 = inlined_call_operand.vmem [shape: bf16[5,128,512], index: 2, kind: input, shape index: {}]   ;;  %s6340_s3 = inlined_call_operand.vmem [shape: f32[5,1,512], index: 3, kind: input, shape index: {}]   ;;  %s6341_s6 = inlined_call_operand.vmem [shape: f32[5,8,128], index: 6, kind: output, shape index: {2}]   ;;  %s6342_s5 = inlined_call_operand.vmem [shape: f32[5,8,128], index: 5, kind: output, shape index: {1}]   ;;  %s6343_s4 = inlined_call_operand.vmem [shape: f32[2,8,128], index: 4, kind: output, shape index: {0}]  }
   0x1   :  { %v4276_v0 = vld [vmem:[%s6337_s1 + $0x4] ss:$16 sps:$4 sm:$0xff]   ;;  %318 = vmatprep.mubr.bf16.mxu0 %v4924_v1  ;;  %361 = vmatprep.mubr.bf16.mxu1 %v4924_v1  ;;  %v4278_v2 = vld [vmem:[%s6337_s1 + $0xc] ss:$16 sps:$4 sm:$0xff]   ;;  %v4280_v3 = vld [vmem:[%s6337_s1] ss:$16 sps:$4 sm:$0xff]  }
   0x2   :  { %286 = vmatprep.subr.bf16.mxu0 %v4276_v0  ;;  %v4281_v4 = vld [vmem:[%s6337_s1 + $0x8] ss:$16 sps:$4 sm:$0xff]   ;;  %329 = vmatprep.subr.bf16.mxu1 %v4278_v2  ;;  %v4282_v5 = vld [vmem:[%s6337_s1 + $0x24] ss:$16 sps:$4 sm:$0xff]   ;;  %v4284_v6 = vld [vmem:[%s6337_s1 + $0x2c] ss:$16 sps:$4 sm:$0xff]  }
   0x3   :  { %287 = vmatpush1.bf16.msra.mxu0 %v4280_v3  ;;  %330 = vmatpush1.bf16.msra.mxu1 %v4281_v4  ;;  %v4286_v7 = vld [vmem:[%s6337_s1 + $0x20] ss:$16 sps:$4 sm:$0xff]   ;;  %v4287_v8 = vld [vmem:[%s6337_s1 + $0x28] ss:$16 sps:$4 sm:$0xff]   ;;  %v4288_v9 = vld [vmem:[%s6337_s1 + $0x44] ss:$16 sps:$4 sm:$0xff]  }
   0x4   :  { %288 = vmatprep.subr.bf16.mxu0 %v4282_v5  ;;  %331 = vmatprep.subr.bf16.mxu1 %v4284_v6  ;;  %v4290_v10 = vld [vmem:[%s6337_s1 + $0x4c] ss:$16 sps:$4 sm:$0xff]   ;;  %v4292_v11 = vld [vmem:[%s6337_s1 + $0x40] ss:$16 sps:$4 sm:$0xff]   ;;  %v4293_v12 = vld [vmem:[%s6337_s1 + $0x48] ss:$16 sps:$4 sm:$0xff]  }
   0x5   :  { %v4294_v13 = vld [vmem:[%s6337_s1 + $0x64] ss:$16 sps:$4 sm:$0xff]   ;;  %v4296_v14 = vld [vmem:[%s6337_s1 + $0x6c] ss:$16 sps:$4 sm:$0xff]   ;;  %v4298_v15 = vld [vmem:[%s6337_s1 + $0x60] ss:$16 sps:$4 sm:$0xff]  }
   0x6   :  { %v4299_v16 = vld [vmem:[%s6337_s1 + $0x68] ss:$16 sps:$4 sm:$0xff]   ;;  %v4300_v17 = vld [vmem:[%s6337_s1 + $0x84] ss:$16 sps:$4 sm:$0xff]   ;;  %v4302_v18 = vld [vmem:[%s6337_s1 + $0x8c] ss:$16 sps:$4 sm:$0xff]  }
   0x7   :  { %289 = vmatpush1.bf16.msra.mxu0 %v4286_v7  ;;  %332 = vmatpush1.bf16.msra.mxu1 %v4287_v8  ;;  %v4304_v19 = vld [vmem:[%s6337_s1 + $0x80] ss:$16 sps:$4 sm:$0xff]   ;;  %v4305_v20 = vld [vmem:[%s6337_s1 + $0x88] ss:$16 sps:$4 sm:$0xff]   ;;  %v4306_v21 = vld [vmem:[%s6337_s1 + $0xa4] ss:$16 sps:$4 sm:$0xff]  }
   0x8   :  { %290 = vmatprep.subr.bf16.mxu0 %v4288_v9  ;;  %333 = vmatprep.subr.bf16.mxu1 %v4290_v10  ;;  %v4308_v22 = vld [vmem:[%s6337_s1 + $0xac] ss:$16 sps:$4 sm:$0xff]   ;;  %v4310_v23 = vld [vmem:[%s6337_s1 + $0xa0] ss:$16 sps:$4 sm:$0xff]   ;;  %v4311_v24 = vld [vmem:[%s6337_s1 + $0xa8] ss:$16 sps:$4 sm:$0xff]  }
   0x9   :  { %v4312_v25 = vld [vmem:[%s6337_s1 + $0xc4] ss:$16 sps:$4 sm:$0xff]   ;;  %v4314_v26 = vld [vmem:[%s6337_s1 + $0xcc] ss:$16 sps:$4 sm:$0xff]   ;;  %v4316_v31 = vld [vmem:[%s6337_s1 + $0xc0] ss:$16 sps:$4 sm:$0xff]  }
   0xa   :  { %v21_v27 = vld [vmem:[%s6338_s0] sm:$0xff]  ;;  %v22_v28 = vld [vmem:[%s6338_s0 + $0x8] sm:$0xff] }
   0xb   :  { %291 = vmatpush1.bf16.msra.mxu0 %v4292_v11  ;;  %334 = vmatpush1.bf16.msra.mxu1 %v4293_v12  ;;  %v3654_v29 = vmul.f32 -0.1, %v21_v27  ;;  %v3655_v30 = vmul.f32 -0.1, %v22_v28  ;;  %v4317_v32 = vld [vmem:[%s6337_s1 + $0xc8] ss:$16 sps:$4 sm:$0xff]  }
   0xc   :  { %292 = vmatprep.subr.bf16.mxu0 %v4294_v13  ;;  %335 = vmatprep.subr.bf16.mxu1 %v4296_v14  ;;  %v4318_v35 = vld [vmem:[%s6337_s1 + $0xe4] ss:$16 sps:$4 sm:$0xff]   ;;  %v4320_v36 = vld [vmem:[%s6337_s1 + $0xec] ss:$16 sps:$4 sm:$0xff]   ;;  %v4322_v37 = vld [vmem:[%s6337_s1 + $0xe0] ss:$16 sps:$4 sm:$0xff]  }
   0xd   :  { %v27_v33 = vmul.f32 1.442695, %v3654_v29  ;;  %v29_v34 = vmul.f32 1.442695, %v3655_v30  ;;  %v4323_v38 = vld [vmem:[%s6337_s1 + $0xe8] ss:$16 sps:$4 sm:$0xff]  }
   0xe   :  { %v5067_v39 = vld [vmem:[%s6339_s2 + $0x4] ss:$16 sps:$4 sm:$0xff]   ;;  %v5072_v40 = vld [vmem:[%s6339_s2 + $0xc] ss:$16 sps:$4 sm:$0xff]   ;;  %v5079_v48 = vld [vmem:[%s6339_s2] ss:$16 sps:$4 sm:$0xff]  }
   0xf   :  { %293 = vmatpush1.bf16.msra.mxu0 %v4298_v15  ;;  %336 = vmatpush1.bf16.msra.mxu1 %v4299_v16  ;;  %4756 = vpow2.f32 %v27_v33  ;;  %v5084_v49 = vld [vmem:[%s6339_s2 + $0x8] ss:$16 sps:$4 sm:$0xff]   ;;  %v5089_v51 = vld [vmem:[%s6339_s2 + $0x24] ss:$16 sps:$4 sm:$0xff]   ;;  %v5094_v52 = vld [vmem:[%s6339_s2 + $0x2c] ss:$16 sps:$4 sm:$0xff]  }
  0x10   :  { %294 = vmatprep.subr.bf16.mxu0 %v4300_v17  ;;  %337 = vmatprep.subr.bf16.mxu1 %v4302_v18  ;;  %4758 = vpow2.f32 %v29_v34  ;;  %v5099_v54 = vld [vmem:[%s6339_s2 + $0x20] ss:$16 sps:$4 sm:$0xff]   ;;  %v5104_v55 = vld [vmem:[%s6339_s2 + $0x28] ss:$16 sps:$4 sm:$0xff]   ;;  %v5109_v56 = vld [vmem:[%s6339_s2 + $0x44] ss:$16 sps:$4 sm:$0xff]   ;;  %v106_v17 = vlaneseq }
  0x11   :  { %v5114_v57 = vld [vmem:[%s6339_s2 + $0x4c] ss:$16 sps:$4 sm:$0xff]   ;;  %v5123_v58 = vld [vmem:[%s6339_s2 + $0x40] ss:$16 sps:$4 sm:$0xff]   ;;  %v5128_v59 = vld [vmem:[%s6339_s2 + $0x48] ss:$16 sps:$4 sm:$0xff]  }
  0x12   :  { %v4344_v60 = vld [vmem:[%s6339_s2 + $0x64] ss:$16 sps:$4 sm:$0xff]   ;;  %v4347_v61 = vld [vmem:[%s6339_s2 + $0x6c] ss:$16 sps:$4 sm:$0xff]   ;;  %v4342_v62 = vld [vmem:[%s6339_s2 + $0x60] ss:$16 sps:$4 sm:$0xff]  }
  0x13   :  { %295 = vmatpush1.bf16.msra.mxu0 %v4304_v19  ;;  %338 = vmatpush1.bf16.msra.mxu1 %v4305_v20  ;;  %v4345_v63 = vld [vmem:[%s6339_s2 + $0x68] ss:$16 sps:$4 sm:$0xff]   ;;  %v4350_v0 = vld [vmem:[%s6339_s2 + $0x84] ss:$16 sps:$4 sm:$0xff]   ;;  %v4353_v2 = vld [vmem:[%s6339_s2 + $0x8c] ss:$16 sps:$4 sm:$0xff]  }
  0x14   :  { %296 = vmatprep.subr.bf16.mxu0 %v4306_v21  ;;  %339 = vmatprep.subr.bf16.mxu1 %v4308_v22  ;;  %v4348_v3 = vld [vmem:[%s6339_s2 + $0x80] ss:$16 sps:$4 sm:$0xff]   ;;  %v4351_v4 = vld [vmem:[%s6339_s2 + $0x88] ss:$16 sps:$4 sm:$0xff]   ;;  %v4356_v5 = vld [vmem:[%s6339_s2 + $0xa4] ss:$16 sps:$4 sm:$0xff]  }
  0x15   :  { %v4359_v6 = vld [vmem:[%s6339_s2 + $0xac] ss:$16 sps:$4 sm:$0xff]   ;;  %v4354_v7 = vld [vmem:[%s6339_s2 + $0xa0] ss:$16 sps:$4 sm:$0xff]   ;;  %v4357_v8 = vld [vmem:[%s6339_s2 + $0xa8] ss:$16 sps:$4 sm:$0xff]  }
  0x16   :  { %v4362_v9 = vld [vmem:[%s6339_s2 + $0xc4] ss:$16 sps:$4 sm:$0xff]   ;;  %v4365_v10 = vld [vmem:[%s6339_s2 + $0xcc] ss:$16 sps:$4 sm:$0xff]   ;;  %v4360_v11 = vld [vmem:[%s6339_s2 + $0xc0] ss:$16 sps:$4 sm:$0xff]  }
  0x17   :  { %297 = vmatpush1.bf16.msra.mxu0 %v4310_v23  ;;  %340 = vmatpush1.bf16.msra.mxu1 %v4311_v24  ;;  %v4363_v12 = vld [vmem:[%s6339_s2 + $0xc8] ss:$16 sps:$4 sm:$0xff]   ;;  %v4368_v13 = vld [vmem:[%s6339_s2 + $0xe4] ss:$16 sps:$4 sm:$0xff]   ;;  %v4371_v14 = vld [vmem:[%s6339_s2 + $0xec] ss:$16 sps:$4 sm:$0xff]  }
  0x18   :  { %298 = vmatprep.subr.bf16.mxu0 %v4312_v25  ;;  %341 = vmatprep.subr.bf16.mxu1 %v4314_v26  ;;  %v4366_v15 = vld [vmem:[%s6339_s2 + $0xe0] ss:$16 sps:$4 sm:$0xff]   ;;  %v4369_v16 = vld [vmem:[%s6339_s2 + $0xe8] ss:$16 sps:$4 sm:$0xff]   ;;  %v107_v18 = vshrl.u32 %v106_v17, 7 }
  0x19   :  { %v4757_v41 = vpop.eup %4756  ;;  %v103_v21 = vld [vmem:[%s6340_s3] sm:$0xf]  ;;  %v4383_v17 = vld [vmem:[%s6337_s1 + $0x12c] ss:$16 sps:$4 sm:$0xff]  }
  0x1a   :  { %v4759_v42 = vpop.eup %4758  ;;  %v31_v43 = vadd.f32 1.0, %v4757_v41  ;;  %v5214_v19 = vsub.s32 0, %v107_v18  ;;  %v5216_v20 = vsub.s32 2, %v107_v18  ;;  %v5221_v22 = vsub.s32 3, %v107_v18 }
  0x1b   :  { %299 = vmatpush1.bf16.msra.mxu0 %v4316_v31  ;;  %342 = vmatpush1.bf16.msra.mxu1 %v4317_v32  ;;  %v32_v44 = vadd.f32 1.0, %v4759_v42  ;;  %v5223_v23 = vsub.s32 1, %v107_v18  ;;  %v4378_v18 = vld [vmem:[%s6337_s1 + $0x120] ss:$16 sps:$4 sm:$0xff]  }
  0x1c   :  { %300 = vmatprep.subr.bf16.mxu0 %v4318_v35  ;;  %343 = vmatprep.subr.bf16.mxu1 %v4320_v36  ;;  %4760 = vrcp.f32 %v31_v43  ;;  %v109_v24 = vrot.slane %v103_v21, %v5214_v19  ;;  %v117_v25 = vrot.slane %v103_v21, %v5216_v20  ;;  %v121_v28 = vrot.slane %v103_v21, %v5221_v22 }
  0x1d   :  { %4762 = vrcp.f32 %v32_v44  ;;  %v113_v31 = vrot.slane %v103_v21, %v5223_v23  ;;  %v4381_v21 = vld [vmem:[%s6337_s1 + $0x128] ss:$16 sps:$4 sm:$0xff]  }
  0x1f   :  { %301 = vmatpush1.bf16.msra.mxu0 %v4322_v37  ;;  %344 = vmatpush1.bf16.msra.mxu1 %v4323_v38 }
  0x20   :  { %532 = vmatprep.subr.bf16.mxu0 %v5067_v39  ;;  %573 = vmatprep.subr.bf16.mxu1 %v5072_v40 }
  0x26   :  { %v4761_v45 = vpop.eup %4760 }
  0x27   :  { %v4763_v46 = vpop.eup %4762  ;;  %v37_v47 = vmul.f32 5.0, %v4761_v45 }
  0x28   :  { %v38_v50 = vmul.f32 5.0, %v4763_v46 }
  0x2a   :  { %v104_v53 = vpack.c.bf16 %v38_v50, %v37_v47 }
  0x2c   :  { %319 = vmatmul.mubr.bf16.vlgmr.msra.gmra.mrb[0].mxu0 %v104_v53  ;;  %362 = vmatmul.mubr.bf16.vlgmr.msra.gmra.mrb[0].mxu1 %v104_v53 }
  0x2d   :  { %533 = vmatpush1.bf16.msra.mxu0 %v5079_v48  ;;  %574 = vmatpush1.bf16.msra.mxu1 %v5084_v49 }
  0x2e   :  { %534 = vmatprep.subr.bf16.mxu0 %v5089_v51  ;;  %575 = vmatprep.subr.bf16.mxu1 %v5094_v52 }
  0x2f   :  { %564 = vmatprep.mubr.bf16.mxu0 %v4924_v1  ;;  %605 = vmatprep.mubr.bf16.mxu1 %v4924_v1 }
  0x31   :  { %535 = vmatpush1.bf16.msra.mxu0 %v5099_v54  ;;  %576 = vmatpush1.bf16.msra.mxu1 %v5104_v55 }
  0x32   :  { %536 = vmatprep.subr.bf16.mxu0 %v5109_v56  ;;  %577 = vmatprep.subr.bf16.mxu1 %v5114_v57 }
  0x35   :  { %537 = vmatpush1.bf16.msra.mxu0 %v5123_v58  ;;  %578 = vmatpush1.bf16.msra.mxu1 %v5128_v59 }
  0x36   :  { %538 = vmatprep.subr.bf16.mxu0 %v4344_v60  ;;  %579 = vmatprep.subr.bf16.mxu1 %v4347_v61 }
  0x39   :  { %539 = vmatpush1.bf16.msra.mxu0 %v4342_v62  ;;  %580 = vmatpush1.bf16.msra.mxu1 %v4345_v63 }
  0x3a   :  { %540 = vmatprep.subr.bf16.mxu0 %v4350_v0  ;;  %581 = vmatprep.subr.bf16.mxu1 %v4353_v2 }
  0x3d   :  { %541 = vmatpush1.bf16.msra.mxu0 %v4348_v3  ;;  %582 = vmatpush1.bf16.msra.mxu1 %v4351_v4 }
  0x3e   :  { %542 = vmatprep.subr.bf16.mxu0 %v4356_v5  ;;  %583 = vmatprep.subr.bf16.mxu1 %v4359_v6 }
  0x41   :  { %543 = vmatpush1.bf16.msra.mxu0 %v4354_v7  ;;  %584 = vmatpush1.bf16.msra.mxu1 %v4357_v8 }
  0x42   :  { %544 = vmatprep.subr.bf16.mxu0 %v4362_v9  ;;  %585 = vmatprep.subr.bf16.mxu1 %v4365_v10 }
  0x45   :  { %545 = vmatpush1.bf16.msra.mxu0 %v4360_v11  ;;  %586 = vmatpush1.bf16.msra.mxu1 %v4363_v12 }
  0x46   :  { %546 = vmatprep.subr.bf16.mxu0 %v4368_v13  ;;  %587 = vmatprep.subr.bf16.mxu1 %v4371_v14 }
  0x49   :  { %547 = vmatpush1.bf16.msra.mxu0 %v4366_v15  ;;  %588 = vmatpush1.bf16.msra.mxu1 %v4369_v16 }
  0x4a   :  { %643 = vmatprep.subr.bf16.mxu0 %v5067_v39  ;;  %684 = vmatprep.subr.bf16.mxu1 %v5072_v40 }
  0x4c   :  { %565 = vmatmul.mubr.bf16.vlgmr.msra.gmra.mrb[4].mxu0 %v4924_v1  ;;  %606 = vmatmul.mubr.bf16.vlgmr.msra.gmra.mrb[4].mxu1 %v4924_v1 }
  0x4d   :  { %644 = vmatpush1.bf16.msra.mxu0 %v5079_v48  ;;  %685 = vmatpush1.bf16.msra.mxu1 %v5084_v49 }
  0x4e   :  { %645 = vmatprep.subr.bf16.mxu0 %v5089_v51  ;;  %686 = vmatprep.subr.bf16.mxu1 %v5094_v52 }
  0x4f   :  { %675 = vmatprep.mubr.bf16.mxu0 %v4924_v1  ;;  %716 = vmatprep.mubr.bf16.mxu1 %v4924_v1 }
  0x51   :  { %646 = vmatpush1.bf16.msra.mxu0 %v5099_v54  ;;  %687 = vmatpush1.bf16.msra.mxu1 %v5104_v55 }
  0x52   :  { %647 = vmatprep.subr.bf16.mxu0 %v5109_v56  ;;  %688 = vmatprep.subr.bf16.mxu1 %v5114_v57 }
  0x55   :  { %648 = vmatpush1.bf16.msra.mxu0 %v5123_v58  ;;  %689 = vmatpush1.bf16.msra.mxu1 %v5128_v59 }
  0x56   :  { %649 = vmatprep.subr.bf16.mxu0 %v4344_v60  ;;  %690 = vmatprep.subr.bf16.mxu1 %v4347_v61 }
  0x59   :  { %650 = vmatpush1.bf16.msra.mxu0 %v4342_v62  ;;  %691 = vmatpush1.bf16.msra.mxu1 %v4345_v63 }
  0x5a   :  { %651 = vmatprep.subr.bf16.mxu0 %v4350_v0  ;;  %692 = vmatprep.subr.bf16.mxu1 %v4353_v2 }
  0x5d   :  { %652 = vmatpush1.bf16.msra.mxu0 %v4348_v3  ;;  %693 = vmatpush1.bf16.msra.mxu1 %v4351_v4 }
  0x5e   :  { %653 = vmatprep.subr.bf16.mxu0 %v4356_v5  ;;  %694 = vmatprep.subr.bf16.mxu1 %v4359_v6 }
  0x61   :  { %654 = vmatpush1.bf16.msra.mxu0 %v4354_v7  ;;  %695 = vmatpush1.bf16.msra.mxu1 %v4357_v8 }
  0x62   :  { %655 = vmatprep.subr.bf16.mxu0 %v4362_v9  ;;  %696 = vmatprep.subr.bf16.mxu1 %v4365_v10 }
  0x65   :  { %656 = vmatpush1.bf16.msra.mxu0 %v4360_v11  ;;  %697 = vmatpush1.bf16.msra.mxu1 %v4363_v12  ;;  %v4374_v12 = vld [vmem:[%s6337_s1 + $0x104] ss:$16 sps:$4 sm:$0xff]  }
  0x66   :  { %657 = vmatprep.subr.bf16.mxu0 %v4368_v13  ;;  %698 = vmatprep.subr.bf16.mxu1 %v4371_v14  ;;  %v4377_v13 = vld [vmem:[%s6337_s1 + $0x10c] ss:$16 sps:$4 sm:$0xff]   ;;  %v4372_v14 = vld [vmem:[%s6337_s1 + $0x100] ss:$16 sps:$4 sm:$0xff]  }
  0x69   :  { %658 = vmatpush1.bf16.msra.mxu0 %v4366_v15  ;;  %699 = vmatpush1.bf16.msra.mxu1 %v4369_v16  ;;  %v4375_v15 = vld [vmem:[%s6337_s1 + $0x108] ss:$16 sps:$4 sm:$0xff]   ;;  %v4380_v16 = vld [vmem:[%s6337_s1 + $0x124] ss:$16 sps:$4 sm:$0xff]  }
  0x6a   :  { %1005 = vmatprep.subr.bf16.mxu0 %v4374_v12  ;;  %1048 = vmatprep.subr.bf16.mxu1 %v4377_v13 }
  0xff   :  { %v320_v26 = vpop.f32.mrb[0].mxu0  ;;  %v363_v27 = vpop.f32.mrb[0].mxu1 }
 0x100   :  { %v322_v29 = vpop.f32.mrb[1].mxu0  ;;  %v365_v30 = vpop.f32.mrb[1].mxu1  ;;  %v321_v40 = vadd.f32 %v320_v26, %v109_v24  ;;  %v364_v41 = vadd.f32 %v363_v27, %v117_v25  ;;  %v4384_v26 = vld [vmem:[%s6337_s1 + $0x140] ss:$16 sps:$4 sm:$0xff]   ;;  %v4387_v27 = vld [vmem:[%s6337_s1 + $0x148] ss:$16 sps:$4 sm:$0xff]  }
 0x101   :  { %v324_v32 = vpop.f32.mrb[2].mxu0  ;;  %v367_v33 = vpop.f32.mrb[2].mxu1  ;;  %v323_v42 = vadd.f32 %v322_v29, %v113_v31  ;;  %v366_v43 = vadd.f32 %v365_v30, %v121_v28  ;;  %v4395_v29 = vld [vmem:[%s6337_s1 + $0x16c] ss:$16 sps:$4 sm:$0xff]   ;;  %v4390_v30 = vld [vmem:[%s6337_s1 + $0x160] ss:$16 sps:$4 sm:$0xff]  }
 0x102   :  { %v5229_v34 = vadd.f32 %v324_v32, %v109_v24  ;;  %v326_v35 = vpop.f32.mrb[3].mxu0  ;;  %v5231_v36 = vadd.f32 %v367_v33, %v117_v25  ;;  %v369_v37 = vpop.f32.mrb[3].mxu1  ;;  %v4386_v24 = vld [vmem:[%s6337_s1 + $0x144] ss:$16 sps:$4 sm:$0xff]   ;;  %v4389_v25 = vld [vmem:[%s6337_s1 + $0x14c] ss:$16 sps:$4 sm:$0xff]  }
 0x103   :  { %v5233_v38 = vadd.f32 %v326_v35, %v113_v31  ;;  %v5235_v39 = vadd.f32 %v369_v37, %v121_v28  ;;  %v4392_v28 = vld [vmem:[%s6337_s1 + $0x164] ss:$16 sps:$4 sm:$0xff]   ;;  %v4393_v31 = vld [vmem:[%s6337_s1 + $0x168] ss:$16 sps:$4 sm:$0xff]   ;;  %v4401_v33 = vld [vmem:[%s6337_s1 + $0x18c] ss:$16 sps:$4 sm:$0xff]  }
 0x104   :  { %v4398_v32 = vld [vmem:[%s6337_s1 + $0x184] ss:$16 sps:$4 sm:$0xff]   ;;  %v4396_v35 = vld [vmem:[%s6337_s1 + $0x180] ss:$16 sps:$4 sm:$0xff]   ;;  %v4399_v37 = vld [vmem:[%s6337_s1 + $0x188] ss:$16 sps:$4 sm:$0xff]  }
 0x11f   :  { %v566_v44 = vpop.f32.mrb[4].mxu0  ;;  %v607_v45 = vpop.f32.mrb[4].mxu1 }
 0x120   :  { %v614_v46 = vadd.f32 %v566_v44, %v321_v40  ;;  %v616_v47 = vadd.f32 %v607_v45, %v364_v41  ;;  %v568_v48 = vpop.f32.mrb[5].mxu0  ;;  %v609_v49 = vpop.f32.mrb[5].mxu1  ;;  %v4402_v40 = vld [vmem:[%s6337_s1 + $0x1a0] ss:$16 sps:$4 sm:$0xff]   ;;  %v4404_v41 = vld [vmem:[%s6337_s1 + $0x1a4] ss:$16 sps:$4 sm:$0xff]  }
 0x121   :  { %v615_v50 = vadd.f32 %v568_v48, %v323_v42  ;;  %v617_v51 = vadd.f32 %v609_v49, %v366_v43  ;;  %v570_v52 = vpop.f32.mrb[6].mxu0  ;;  %v611_v53 = vpop.f32.mrb[6].mxu1  ;;  %v4405_v42 = vld [vmem:[%s6337_s1 + $0x1a8] ss:$16 sps:$4 sm:$0xff]   ;;  %v4407_v43 = vld [vmem:[%s6337_s1 + $0x1ac] ss:$16 sps:$4 sm:$0xff]  }
 0x122   :  { %v3720_v54 = vmul.f32 -1.442695, %v614_v46  ;;  %v571_v55 = vpop.f32.mrb[7].mxu0  ;;  %v612_v56 = vpop.f32.mrb[7].mxu1  ;;  %v4410_v44 = vld [vmem:[%s6337_s1 + $0x1c4] ss:$16 sps:$4 sm:$0xff]  }
 0x123   :  { %v3721_v57 = vmul.f32 -1.442695, %v615_v50  ;;  %v3722_v58 = vmul.f32 -1.442695, %v617_v51  ;;  %v4413_v45 = vld [vmem:[%s6337_s1 + $0x1cc] ss:$16 sps:$4 sm:$0xff]  }
 0x124   :  { %4764 = vpow2.f32 %v3720_v54  ;;  %v4408_v46 = vld [vmem:[%s6337_s1 + $0x1c0] ss:$16 sps:$4 sm:$0xff]   ;;  %v4416_v48 = vld [vmem:[%s6337_s1 + $0x1e4] ss:$16 sps:$4 sm:$0xff]   ;;  %v4419_v49 = vld [vmem:[%s6337_s1 + $0x1ec] ss:$16 sps:$4 sm:$0xff]  }
 0x125   :  { %4766 = vpow2.f32 %v3721_v57  ;;  %v4414_v50 = vld [vmem:[%s6337_s1 + $0x1e0] ss:$16 sps:$4 sm:$0xff]   ;;  %v4417_v51 = vld [vmem:[%s6337_s1 + $0x1e8] ss:$16 sps:$4 sm:$0xff]   ;;  %v5345_v52 = vld [vmem:[%s6339_s2 + $0x104] ss:$16 sps:$4 sm:$0xff]  }
 0x126   :  { %4768 = vpow2.f32 %v3722_v58  ;;  %v5350_v53 = vld [vmem:[%s6339_s2 + $0x10c] ss:$16 sps:$4 sm:$0xff]  }
 0x127   :  { %4770 = vtanh.f32 %v616_v47  ;;  %v4411_v47 = vld [vmem:[%s6337_s1 + $0x1c8] ss:$16 sps:$4 sm:$0xff]  }
 0x12e   :  { %v4765_v59 = vpop.eup %4764 }
 0x12f   :  { %v4767_v60 = vpop.eup %4766  ;;  %v621_v61 = vadd.f32 1.0, %v4765_v59 }
 0x130   :  { %v627_v62 = vadd.f32 1.0, %v4767_v60  ;;  %v4769_v63 = vpop.eup %4768 }
 0x131   :  { %4772 = vrcp.f32 %v621_v61  ;;  %v4771_v0 = vpop.eup %4770  ;;  %v634_v5 = vadd.f32 1.0, %v4769_v63 }
 0x132   :  { %4774 = vrcp.f32 %v627_v62 }
 0x133   :  { %4776 = vrcp.f32 %v634_v5 }
 0x13b   :  { %v4773_v2 = vpop.eup %4772 }
 0x13c   :  { %v4775_v3 = vpop.eup %4774  ;;  %v638_v4 = vmul.f32 %v4773_v2, %v4771_v0 }
 0x13d   :  { %v637_v6 = vmul.f32 0.0, %v4775_v3  ;;  %v4777_v8 = vpop.eup %4776 }
 0x13f   :  { %v5237_v7 = vadd.f32 %v638_v4, %v637_v6 }
 0x141   :  { %4778 = vtanh.f32 %v5237_v7 }
 0x14b   :  { %v4779_v9 = vpop.eup %4778 }
 0x14c   :  { %v5240_v10 = vmul.f32 %v4779_v9, %v4777_v8 }
 0x14e   :  { %v642_v11 = vpack.c.bf16 %v5240_v10, %v5240_v10 }
 0x150   :  { %676 = vmatmul.mubr.bf16.vlgmr.msra.gmra.mrb[8].mxu0 %v642_v11  ;;  %717 = vmatmul.mubr.bf16.vlgmr.msra.gmra.mrb[8].mxu1 %v642_v11 }
 0x151   :  { %1037 = vmatprep.mubr.bf16.mxu0 %v4924_v1  ;;  %1080 = vmatprep.mubr.bf16.mxu1 %v4924_v1 }
 0x152   :  { %1006 = vmatpush1.bf16.msra.mxu0 %v4372_v14  ;;  %1049 = vmatpush1.bf16.msra.mxu1 %v4375_v15 }
 0x153   :  { %1007 = vmatprep.subr.bf16.mxu0 %v4380_v16  ;;  %1050 = vmatprep.subr.bf16.mxu1 %v4383_v17 }
 0x156   :  { %1008 = vmatpush1.bf16.msra.mxu0 %v4378_v18  ;;  %1051 = vmatpush1.bf16.msra.mxu1 %v4381_v21  ;;  %v5365_v21 = vld [vmem:[%s6339_s2 + $0x100] ss:$16 sps:$4 sm:$0xff]  }
 0x157   :  { %1009 = vmatprep.subr.bf16.mxu0 %v4386_v24  ;;  %1052 = vmatprep.subr.bf16.mxu1 %v4389_v25  ;;  %v5370_v24 = vld [vmem:[%s6339_s2 + $0x108] ss:$16 sps:$4 sm:$0xff]   ;;  %v5379_v25 = vld [vmem:[%s6339_s2 + $0x124] ss:$16 sps:$4 sm:$0xff]  }
 0x15a   :  { %1010 = vmatpush1.bf16.msra.mxu0 %v4384_v26  ;;  %1053 = vmatpush1.bf16.msra.mxu1 %v4387_v27  ;;  %v5384_v26 = vld [vmem:[%s6339_s2 + $0x12c] ss:$16 sps:$4 sm:$0xff]   ;;  %v5396_v27 = vld [vmem:[%s6339_s2 + $0x128] ss:$16 sps:$4 sm:$0xff]  }
 0x15b   :  { %1011 = vmatprep.subr.bf16.mxu0 %v4392_v28  ;;  %1054 = vmatprep.subr.bf16.mxu1 %v4395_v29  ;;  %v5403_v28 = vld [vmem:[%s6339_s2 + $0x144] ss:$16 sps:$4 sm:$0xff]   ;;  %v5408_v29 = vld [vmem:[%s6339_s2 + $0x14c] ss:$16 sps:$4 sm:$0xff]  }
 0x15e   :  { %1012 = vmatpush1.bf16.msra.mxu0 %v4390_v30  ;;  %1055 = vmatpush1.bf16.msra.mxu1 %v4393_v31  ;;  %v4432_v30 = vld [vmem:[%s6339_s2 + $0x140] ss:$16 sps:$4 sm:$0xff]   ;;  %v4435_v31 = vld [vmem:[%s6339_s2 + $0x148] ss:$16 sps:$4 sm:$0xff]  }
 0x15f   :  { %1013 = vmatprep.subr.bf16.mxu0 %v4398_v32  ;;  %1056 = vmatprep.subr.bf16.mxu1 %v4401_v33  ;;  %v4440_v32 = vld [vmem:[%s6339_s2 + $0x164] ss:$16 sps:$4 sm:$0xff]   ;;  %v4443_v33 = vld [vmem:[%s6339_s2 + $0x16c] ss:$16 sps:$4 sm:$0xff]  }
 0x162   :  { %1014 = vmatpush1.bf16.msra.mxu0 %v4396_v35  ;;  %1057 = vmatpush1.bf16.msra.mxu1 %v4399_v37  ;;  %v4438_v35 = vld [vmem:[%s6339_s2 + $0x160] ss:$16 sps:$4 sm:$0xff]   ;;  %v4441_v37 = vld [vmem:[%s6339_s2 + $0x168] ss:$16 sps:$4 sm:$0xff]  }
 0x163   :  { %1015 = vmatprep.subr.bf16.mxu0 %v4404_v41  ;;  %1058 = vmatprep.subr.bf16.mxu1 %v4407_v43  ;;  %v4449_v41 = vld [vmem:[%s6339_s2 + $0x18c] ss:$16 sps:$4 sm:$0xff]   ;;  %v4447_v43 = vld [vmem:[%s6339_s2 + $0x188] ss:$16 sps:$4 sm:$0xff]  }
 0x166   :  { %1016 = vmatpush1.bf16.msra.mxu0 %v4402_v40  ;;  %1059 = vmatpush1.bf16.msra.mxu1 %v4405_v42  ;;  %v4446_v40 = vld [vmem:[%s6339_s2 + $0x184] ss:$16 sps:$4 sm:$0xff]   ;;  %v4444_v42 = vld [vmem:[%s6339_s2 + $0x180] ss:$16 sps:$4 sm:$0xff]  }
 0x167   :  { %1017 = vmatprep.subr.bf16.mxu0 %v4410_v44  ;;  %1060 = vmatprep.subr.bf16.mxu1 %v4413_v45  ;;  %v4452_v44 = vld [vmem:[%s6339_s2 + $0x1a4] ss:$16 sps:$4 sm:$0xff]   ;;  %v4455_v45 = vld [vmem:[%s6339_s2 + $0x1ac] ss:$16 sps:$4 sm:$0xff]  }
 0x16a   :  { %1018 = vmatpush1.bf16.msra.mxu0 %v4408_v46  ;;  %1061 = vmatpush1.bf16.msra.mxu1 %v4411_v47  ;;  %v4450_v46 = vld [vmem:[%s6339_s2 + $0x1a0] ss:$16 sps:$4 sm:$0xff]   ;;  %v4453_v47 = vld [vmem:[%s6339_s2 + $0x1a8] ss:$16 sps:$4 sm:$0xff]  }
 0x16b   :  { %1019 = vmatprep.subr.bf16.mxu0 %v4416_v48  ;;  %1062 = vmatprep.subr.bf16.mxu1 %v4419_v49  ;;  %v4458_v48 = vld [vmem:[%s6339_s2 + $0x1c4] ss:$16 sps:$4 sm:$0xff]   ;;  %v4461_v49 = vld [vmem:[%s6339_s2 + $0x1cc] ss:$16 sps:$4 sm:$0xff]  }
 0x16e   :  { %1020 = vmatpush1.bf16.msra.mxu0 %v4414_v50  ;;  %1063 = vmatpush1.bf16.msra.mxu1 %v4417_v51  ;;  %v4456_v50 = vld [vmem:[%s6339_s2 + $0x1c0] ss:$16 sps:$4 sm:$0xff]   ;;  %v4459_v51 = vld [vmem:[%s6339_s2 + $0x1c8] ss:$16 sps:$4 sm:$0xff]  }
 0x16f   :  { %1251 = vmatprep.subr.bf16.mxu0 %v5345_v52  ;;  %1292 = vmatprep.subr.bf16.mxu1 %v5350_v53 }
 0x223   :  { %v677_v54 = vpop.f32.mrb[8].mxu0  ;;  %v718_v55 = vpop.f32.mrb[8].mxu1 }
 0x224   :  { %v725_v56 = vadd.f32 %v677_v54, %v5229_v34  ;;  %v727_v57 = vadd.f32 %v718_v55, %v5231_v36  ;;  %v679_v58 = vpop.f32.mrb[9].mxu0  ;;  %v720_v59 = vpop.f32.mrb[9].mxu1  ;;  %v4464_v54 = vld [vmem:[%s6339_s2 + $0x1e4] ss:$16 sps:$4 sm:$0xff]   ;;  %v4467_v55 = vld [vmem:[%s6339_s2 + $0x1ec] ss:$16 sps:$4 sm:$0xff]  }
 0x225   :  { %v726_v60 = vadd.f32 %v679_v58, %v5233_v38  ;;  %v728_v61 = vadd.f32 %v720_v59, %v5235_v39  ;;  %v681_v62 = vpop.f32.mrb[10].mxu0  ;;  %v722_v63 = vpop.f32.mrb[10].mxu1 }
 0x226   :  { %v3723_v0 = vmul.f32 -1.442695, %v725_v56  ;;  %v682_v2 = vpop.f32.mrb[11].mxu0  ;;  %v723_v3 = vpop.f32.mrb[11].mxu1  ;;  %v4462_v56 = vld [vmem:[%s6339_s2 + $0x1e0] ss:$16 sps:$4 sm:$0xff]  }
 0x227   :  { %v3724_v4 = vmul.f32 -1.442695, %v726_v60  ;;  %v3725_v5 = vmul.f32 -1.442695, %v728_v61 }
 0x228   :  { %4780 = vpow2.f32 %v3723_v0 }
 0x229   :  { %4782 = vpow2.f32 %v3724_v4 }
 0x22a   :  { %4784 = vpow2.f32 %v3725_v5 }
 0x22b   :  { %4786 = vtanh.f32 %v727_v57  ;;  %v4465_v57 = vld [vmem:[%s6339_s2 + $0x1e8] ss:$16 sps:$4 sm:$0xff]  }
 0x232   :  { %v4781_v6 = vpop.eup %4780 }
 0x233   :  { %v4783_v8 = vpop.eup %4782  ;;  %v732_v34 = vadd.f32 1.0, %v4781_v6 }
 0x234   :  { %v738_v36 = vadd.f32 1.0, %v4783_v8  ;;  %v4785_v38 = vpop.eup %4784 }
 0x235   :  { %4788 = vrcp.f32 %v732_v34  ;;  %v4787_v9 = vpop.eup %4786  ;;  %v745_v13 = vadd.f32 1.0, %v4785_v38 }
 0x236   :  { %4790 = vrcp.f32 %v738_v36 }
 0x237   :  { %4792 = vrcp.f32 %v745_v13 }
 0x23f   :  { %v4789_v39 = vpop.eup %4788 }
 0x240   :  { %v4791_v11 = vpop.eup %4790  ;;  %v749_v12 = vmul.f32 %v4789_v39, %v4787_v9 }
 0x241   :  { %v748_v14 = vmul.f32 %v4791_v11, %v5237_v7  ;;  %v4793_v16 = vpop.eup %4792 }
 0x243   :  { %v750_v15 = vadd.f32 %v749_v12, %v748_v14 }
 0x245   :  { %4794 = vtanh.f32 %v750_v15  ;;  %754 = vst [vmem:[%s6341_s6] sm:$0xff] %v750_v15 }
 0x24f   :  { %v4795_v17 = vpop.eup %4794 }
 0x250   :  { %v752_v18 = vmul.f32 %v4795_v17, %v4793_v16 }
 0x252   :  { %753 = vst [vmem:[%s6342_s5] sm:$0xff] %v752_v18  ;;  %v823_v7 = vpack.c.bf16 %v752_v18, %v5240_v10  ;;  %v5391_v10 = vld [vmem:[%s6339_s2 + $0x120] ss:$16 sps:$4 sm:$0xff]  }
 0x254   :  { %1038 = vmatmul.mubr.bf16.vlgmr.msra.gmra.mrb[12].mxu0 %v823_v7  ;;  %1081 = vmatmul.mubr.bf16.vlgmr.msra.gmra.mrb[12].mxu1 %v823_v7 }
 0x255   :  { %1252 = vmatpush1.bf16.msra.mxu0 %v5365_v21  ;;  %1293 = vmatpush1.bf16.msra.mxu1 %v5370_v24 }
 0x256   :  { %1253 = vmatprep.subr.bf16.mxu0 %v5379_v25  ;;  %1294 = vmatprep.subr.bf16.mxu1 %v5384_v26 }
 0x257   :  { %1283 = vmatprep.mubr.bf16.mxu0 %v4924_v1  ;;  %1324 = vmatprep.mubr.bf16.mxu1 %v4924_v1 }
 0x259   :  { %1254 = vmatpush1.bf16.msra.mxu0 %v5391_v10  ;;  %1295 = vmatpush1.bf16.msra.mxu1 %v5396_v27 }
 0x25a   :  { %1255 = vmatprep.subr.bf16.mxu0 %v5403_v28  ;;  %1296 = vmatprep.subr.bf16.mxu1 %v5408_v29 }
 0x25d   :  { %1256 = vmatpush1.bf16.msra.mxu0 %v4432_v30  ;;  %1297 = vmatpush1.bf16.msra.mxu1 %v4435_v31 }
 0x25e   :  { %1257 = vmatprep.subr.bf16.mxu0 %v4440_v32  ;;  %1298 = vmatprep.subr.bf16.mxu1 %v4443_v33 }
 0x261   :  { %1258 = vmatpush1.bf16.msra.mxu0 %v4438_v35  ;;  %1299 = vmatpush1.bf16.msra.mxu1 %v4441_v37 }
 0x262   :  { %1259 = vmatprep.subr.bf16.mxu0 %v4446_v40  ;;  %1300 = vmatprep.subr.bf16.mxu1 %v4449_v41 }
 0x265   :  { %1260 = vmatpush1.bf16.msra.mxu0 %v4444_v42  ;;  %1301 = vmatpush1.bf16.msra.mxu1 %v4447_v43 }
 0x266   :  { %1261 = vmatprep.subr.bf16.mxu0 %v4452_v44  ;;  %1302 = vmatprep.subr.bf16.mxu1 %v4455_v45 }
 0x269   :  { %1262 = vmatpush1.bf16.msra.mxu0 %v4450_v46  ;;  %1303 = vmatpush1.bf16.msra.mxu1 %v4453_v47 }
 0x26a   :  { %1263 = vmatprep.subr.bf16.mxu0 %v4458_v48  ;;  %1304 = vmatprep.subr.bf16.mxu1 %v4461_v49 }
 0x26d   :  { %1264 = vmatpush1.bf16.msra.mxu0 %v4456_v50  ;;  %1305 = vmatpush1.bf16.msra.mxu1 %v4459_v51 }
 0x26e   :  { %1265 = vmatprep.subr.bf16.mxu0 %v4464_v54  ;;  %1306 = vmatprep.subr.bf16.mxu1 %v4467_v55 }
 0x271   :  { %1266 = vmatpush1.bf16.msra.mxu0 %v4462_v56  ;;  %1307 = vmatpush1.bf16.msra.mxu1 %v4465_v57 }
 0x272   :  { %1362 = vmatprep.subr.bf16.mxu0 %v5345_v52  ;;  %1403 = vmatprep.subr.bf16.mxu1 %v5350_v53  ;;  %v3790_v52 = vld [vmem:[%s6340_s3 + $0x4] sm:$0xf] }
 0x273   :  { %v828_v59 = vrot.slane %v3790_v52, %v5214_v19  ;;  %v836_v60 = vrot.slane %v3790_v52, %v5216_v20  ;;  %v832_v63 = vrot.slane %v3790_v52, %v5223_v23  ;;  %v840_v0 = vrot.slane %v3790_v52, %v5221_v22  ;;  %v4477_v52 = vld [vmem:[%s6337_s1 + $0x228] ss:$16 sps:$4 sm:$0xff]  }
 0x274   :  { %1284 = vmatmul.mubr.bf16.vlgmr.msra.gmra.mrb[16].mxu0 %v4924_v1  ;;  %1325 = vmatmul.mubr.bf16.vlgmr.msra.gmra.mrb[16].mxu1 %v4924_v1 }
 0x275   :  { %1363 = vmatpush1.bf16.msra.mxu0 %v5365_v21  ;;  %1404 = vmatpush1.bf16.msra.mxu1 %v5370_v24 }
 0x276   :  { %1364 = vmatprep.subr.bf16.mxu0 %v5379_v25  ;;  %1405 = vmatprep.subr.bf16.mxu1 %v5384_v26 }
 0x277   :  { %1394 = vmatprep.mubr.bf16.mxu0 %v4924_v1  ;;  %1435 = vmatprep.mubr.bf16.mxu1 %v4924_v1 }
 0x279   :  { %1365 = vmatpush1.bf16.msra.mxu0 %v5391_v10  ;;  %1406 = vmatpush1.bf16.msra.mxu1 %v5396_v27 }
 0x27a   :  { %1366 = vmatprep.subr.bf16.mxu0 %v5403_v28  ;;  %1407 = vmatprep.subr.bf16.mxu1 %v5408_v29 }
 0x27d   :  { %1367 = vmatpush1.bf16.msra.mxu0 %v4432_v30  ;;  %1408 = vmatpush1.bf16.msra.mxu1 %v4435_v31 }
 0x27e   :  { %1368 = vmatprep.subr.bf16.mxu0 %v4440_v32  ;;  %1409 = vmatprep.subr.bf16.mxu1 %v4443_v33 }
 0x281   :  { %1369 = vmatpush1.bf16.msra.mxu0 %v4438_v35  ;;  %1410 = vmatpush1.bf16.msra.mxu1 %v4441_v37 }
 0x282   :  { %1370 = vmatprep.subr.bf16.mxu0 %v4446_v40  ;;  %1411 = vmatprep.subr.bf16.mxu1 %v4449_v41 }
 0x285   :  { %1371 = vmatpush1.bf16.msra.mxu0 %v4444_v42  ;;  %1412 = vmatpush1.bf16.msra.mxu1 %v4447_v43 }
 0x286   :  { %1372 = vmatprep.subr.bf16.mxu0 %v4452_v44  ;;  %1413 = vmatprep.subr.bf16.mxu1 %v4455_v45 }
 0x289   :  { %1373 = vmatpush1.bf16.msra.mxu0 %v4450_v46  ;;  %1414 = vmatpush1.bf16.msra.mxu1 %v4453_v47 }
 0x28a   :  { %1374 = vmatprep.subr.bf16.mxu0 %v4458_v48  ;;  %1415 = vmatprep.subr.bf16.mxu1 %v4461_v49  ;;  %v4470_v49 = vld [vmem:[%s6337_s1 + $0x204] ss:$16 sps:$4 sm:$0xff]  }
 0x28d   :  { %1375 = vmatpush1.bf16.msra.mxu0 %v4456_v50  ;;  %1416 = vmatpush1.bf16.msra.mxu1 %v4459_v51  ;;  %v4473_v50 = vld [vmem:[%s6337_s1 + $0x20c] ss:$16 sps:$4 sm:$0xff]   ;;  %v4468_v51 = vld [vmem:[%s6337_s1 + $0x200] ss:$16 sps:$4 sm:$0xff]  }
 0x28e   :  { %1376 = vmatprep.subr.bf16.mxu0 %v4464_v54  ;;  %1417 = vmatprep.subr.bf16.mxu1 %v4467_v55  ;;  %v4471_v54 = vld [vmem:[%s6337_s1 + $0x208] ss:$16 sps:$4 sm:$0xff]   ;;  %v4476_v55 = vld [vmem:[%s6337_s1 + $0x224] ss:$16 sps:$4 sm:$0xff]  }
 0x291   :  { %1377 = vmatpush1.bf16.msra.mxu0 %v4462_v56  ;;  %1418 = vmatpush1.bf16.msra.mxu1 %v4465_v57  ;;  %v4479_v56 = vld [vmem:[%s6337_s1 + $0x22c] ss:$16 sps:$4 sm:$0xff]   ;;  %v4474_v57 = vld [vmem:[%s6337_s1 + $0x220] ss:$16 sps:$4 sm:$0xff]  }
 0x292   :  { %1726 = vmatprep.subr.bf16.mxu0 %v4470_v49  ;;  %1769 = vmatprep.subr.bf16.mxu1 %v4473_v50 }
 0x327   :  { %v1039_v53 = vpop.f32.mrb[12].mxu0  ;;  %v1082_v58 = vpop.f32.mrb[12].mxu1 }
 0x328   :  { %v1041_v61 = vpop.f32.mrb[13].mxu0  ;;  %v1084_v62 = vpop.f32.mrb[13].mxu1  ;;  %v1040_v38 = vadd.f32 %v1039_v53, %v828_v59  ;;  %v1083_v9 = vadd.f32 %v1082_v58, %v836_v60  ;;  %v4482_v53 = vld [vmem:[%s6337_s1 + $0x244] ss:$16 sps:$4 sm:$0xff]   ;;  %v4485_v58 = vld [vmem:[%s6337_s1 + $0x24c] ss:$16 sps:$4 sm:$0xff]  }
 0x329   :  { %v1043_v2 = vpop.f32.mrb[14].mxu0  ;;  %v1086_v3 = vpop.f32.mrb[14].mxu1  ;;  %v1042_v39 = vadd.f32 %v1041_v61, %v832_v63  ;;  %v1085_v11 = vadd.f32 %v1084_v62, %v840_v0  ;;  %v4488_v61 = vld [vmem:[%s6337_s1 + $0x264] ss:$16 sps:$4 sm:$0xff]   ;;  %v4491_v62 = vld [vmem:[%s6337_s1 + $0x26c] ss:$16 sps:$4 sm:$0xff]  }
 0x32a   :  { %v5503_v4 = vadd.f32 %v1043_v2, %v828_v59  ;;  %v5505_v5 = vadd.f32 %v1086_v3, %v836_v60  ;;  %v1045_v6 = vpop.f32.mrb[15].mxu0  ;;  %v1088_v8 = vpop.f32.mrb[15].mxu1  ;;  %v4480_v59 = vld [vmem:[%s6337_s1 + $0x240] ss:$16 sps:$4 sm:$0xff]   ;;  %v4483_v60 = vld [vmem:[%s6337_s1 + $0x248] ss:$16 sps:$4 sm:$0xff]  }
 0x32b   :  { %v5507_v34 = vadd.f32 %v1045_v6, %v832_v63  ;;  %v5509_v36 = vadd.f32 %v1088_v8, %v840_v0  ;;  %v4486_v63 = vld [vmem:[%s6337_s1 + $0x260] ss:$16 sps:$4 sm:$0xff]   ;;  %v4489_v0 = vld [vmem:[%s6337_s1 + $0x268] ss:$16 sps:$4 sm:$0xff]   ;;  %v4494_v2 = vld [vmem:[%s6337_s1 + $0x284] ss:$16 sps:$4 sm:$0xff]  }
 0x32c   :  { %v4497_v3 = vld [vmem:[%s6337_s1 + $0x28c] ss:$16 sps:$4 sm:$0xff]   ;;  %v4492_v6 = vld [vmem:[%s6337_s1 + $0x280] ss:$16 sps:$4 sm:$0xff]   ;;  %v4495_v8 = vld [vmem:[%s6337_s1 + $0x288] ss:$16 sps:$4 sm:$0xff]  }
 0x347   :  { %v1285_v12 = vpop.f32.mrb[16].mxu0  ;;  %v1326_v13 = vpop.f32.mrb[16].mxu1 }
 0x348   :  { %v1333_v14 = vadd.f32 %v1285_v12, %v1040_v38  ;;  %v1335_v15 = vadd.f32 %v1326_v13, %v1083_v9  ;;  %v1287_v16 = vpop.f32.mrb[17].mxu0  ;;  %v1328_v17 = vpop.f32.mrb[17].mxu1  ;;  %v4498_v38 = vld [vmem:[%s6337_s1 + $0x2a0] ss:$16 sps:$4 sm:$0xff]   ;;  %v4500_v9 = vld [vmem:[%s6337_s1 + $0x2a4] ss:$16 sps:$4 sm:$0xff]  }
 0x349   :  { %v1334_v18 = vadd.f32 %v1287_v16, %v1042_v39  ;;  %v1336_v21 = vadd.f32 %v1328_v17, %v1085_v11  ;;  %v1289_v24 = vpop.f32.mrb[18].mxu0  ;;  %v1330_v7 = vpop.f32.mrb[18].mxu1  ;;  %v4501_v39 = vld [vmem:[%s6337_s1 + $0x2a8] ss:$16 sps:$4 sm:$0xff]   ;;  %v4503_v11 = vld [vmem:[%s6337_s1 + $0x2ac] ss:$16 sps:$4 sm:$0xff]  }
 0x34a   :  { %v3855_v25 = vmul.f32 -1.442695, %v1333_v14  ;;  %v1290_v26 = vpop.f32.mrb[19].mxu0  ;;  %v1331_v10 = vpop.f32.mrb[19].mxu1  ;;  %v4506_v12 = vld [vmem:[%s6337_s1 + $0x2c4] ss:$16 sps:$4 sm:$0xff]  }
 0x34b   :  { %v3856_v27 = vmul.f32 -1.442695, %v1334_v18  ;;  %v3857_v28 = vmul.f32 -1.442695, %v1336_v21  ;;  %v4509_v13 = vld [vmem:[%s6337_s1 + $0x2cc] ss:$16 sps:$4 sm:$0xff]  }
 0x34c   :  { %4796 = vpow2.f32 %v3855_v25  ;;  %v4504_v14 = vld [vmem:[%s6337_s1 + $0x2c0] ss:$16 sps:$4 sm:$0xff]   ;;  %v4512_v16 = vld [vmem:[%s6337_s1 + $0x2e4] ss:$16 sps:$4 sm:$0xff]   ;;  %v4515_v17 = vld [vmem:[%s6337_s1 + $0x2ec] ss:$16 sps:$4 sm:$0xff]  }
 0x34d   :  { %4798 = vpow2.f32 %v3856_v27  ;;  %v4510_v18 = vld [vmem:[%s6337_s1 + $0x2e0] ss:$16 sps:$4 sm:$0xff]   ;;  %v4513_v21 = vld [vmem:[%s6337_s1 + $0x2e8] ss:$16 sps:$4 sm:$0xff]   ;;  %v5619_v24 = vld [vmem:[%s6339_s2 + $0x204] ss:$16 sps:$4 sm:$0xff]  }
 0x34e   :  { %4800 = vpow2.f32 %v3857_v28  ;;  %v5624_v7 = vld [vmem:[%s6339_s2 + $0x20c] ss:$16 sps:$4 sm:$0xff]  }
 0x34f   :  { %4802 = vtanh.f32 %v1335_v15  ;;  %v4507_v15 = vld [vmem:[%s6337_s1 + $0x2c8] ss:$16 sps:$4 sm:$0xff]  }
 0x356   :  { %v4797_v29 = vpop.eup %4796 }
 0x357   :  { %v4799_v30 = vpop.eup %4798  ;;  %v1340_v31 = vadd.f32 1.0, %v4797_v29 }
 0x358   :  { %v1346_v32 = vadd.f32 1.0, %v4799_v30  ;;  %v4801_v33 = vpop.eup %4800 }
 0x359   :  { %4804 = vrcp.f32 %v1340_v31  ;;  %v4803_v35 = vpop.eup %4802  ;;  %v1353_v42 = vadd.f32 1.0, %v4801_v33 }
 0x35a   :  { %4806 = vrcp.f32 %v1346_v32 }
 0x35b   :  { %4808 = vrcp.f32 %v1353_v42 }
 0x363   :  { %v4805_v37 = vpop.eup %4804 }
 0x364   :  { %v4807_v40 = vpop.eup %4806  ;;  %v1357_v41 = vmul.f32 %v4805_v37, %v4803_v35 }
 0x365   :  { %v1356_v43 = vmul.f32 0.0, %v4807_v40  ;;  %v4809_v45 = vpop.eup %4808 }
 0x367   :  { %v5511_v44 = vadd.f32 %v1357_v41, %v1356_v43 }
 0x369   :  { %4810 = vtanh.f32 %v5511_v44 }
 0x373   :  { %v4811_v46 = vpop.eup %4810 }
 0x374   :  { %v5514_v47 = vmul.f32 %v4811_v46, %v4809_v45 }
 0x376   :  { %v1361_v48 = vpack.c.bf16 %v5514_v47, %v5514_v47 }
 0x378   :  { %1395 = vmatmul.mubr.bf16.vlgmr.msra.gmra.mrb[20].mxu0 %v1361_v48  ;;  %1436 = vmatmul.mubr.bf16.vlgmr.msra.gmra.mrb[20].mxu1 %v1361_v48 }
 0x379   :  { %1758 = vmatprep.mubr.bf16.mxu0 %v4924_v1  ;;  %1801 = vmatprep.mubr.bf16.mxu1 %v4924_v1 }
 0x37a   :  { %1727 = vmatpush1.bf16.msra.mxu0 %v4468_v51  ;;  %1770 = vmatpush1.bf16.msra.mxu1 %v4471_v54 }
 0x37b   :  { %1728 = vmatprep.subr.bf16.mxu0 %v4476_v55  ;;  %1771 = vmatprep.subr.bf16.mxu1 %v4479_v56 }
 0x37e   :  { %1729 = vmatpush1.bf16.msra.mxu0 %v4474_v57  ;;  %1772 = vmatpush1.bf16.msra.mxu1 %v4477_v52  ;;  %v5639_v52 = vld [vmem:[%s6339_s2 + $0x200] ss:$16 sps:$4 sm:$0xff]  }
 0x37f   :  { %1730 = vmatprep.subr.bf16.mxu0 %v4482_v53  ;;  %1773 = vmatprep.subr.bf16.mxu1 %v4485_v58  ;;  %v5644_v53 = vld [vmem:[%s6339_s2 + $0x208] ss:$16 sps:$4 sm:$0xff]   ;;  %v5653_v58 = vld [vmem:[%s6339_s2 + $0x224] ss:$16 sps:$4 sm:$0xff]  }
 0x382   :  { %1731 = vmatpush1.bf16.msra.mxu0 %v4480_v59  ;;  %1774 = vmatpush1.bf16.msra.mxu1 %v4483_v60  ;;  %v5658_v59 = vld [vmem:[%s6339_s2 + $0x22c] ss:$16 sps:$4 sm:$0xff]   ;;  %v5670_v60 = vld [vmem:[%s6339_s2 + $0x228] ss:$16 sps:$4 sm:$0xff]  }
 0x383   :  { %1732 = vmatprep.subr.bf16.mxu0 %v4488_v61  ;;  %1775 = vmatprep.subr.bf16.mxu1 %v4491_v62  ;;  %v5677_v61 = vld [vmem:[%s6339_s2 + $0x244] ss:$16 sps:$4 sm:$0xff]   ;;  %v5682_v62 = vld [vmem:[%s6339_s2 + $0x24c] ss:$16 sps:$4 sm:$0xff]  }
 0x386   :  { %1733 = vmatpush1.bf16.msra.mxu0 %v4486_v63  ;;  %1776 = vmatpush1.bf16.msra.mxu1 %v4489_v0  ;;  %v4528_v63 = vld [vmem:[%s6339_s2 + $0x240] ss:$16 sps:$4 sm:$0xff]   ;;  %v4531_v0 = vld [vmem:[%s6339_s2 + $0x248] ss:$16 sps:$4 sm:$0xff]  }
 0x387   :  { %1734 = vmatprep.subr.bf16.mxu0 %v4494_v2  ;;  %1777 = vmatprep.subr.bf16.mxu1 %v4497_v3  ;;  %v4536_v2 = vld [vmem:[%s6339_s2 + $0x264] ss:$16 sps:$4 sm:$0xff]   ;;  %v4539_v3 = vld [vmem:[%s6339_s2 + $0x26c] ss:$16 sps:$4 sm:$0xff]  }
 0x38a   :  { %1735 = vmatpush1.bf16.msra.mxu0 %v4492_v6  ;;  %1778 = vmatpush1.bf16.msra.mxu1 %v4495_v8  ;;  %v4534_v6 = vld [vmem:[%s6339_s2 + $0x260] ss:$16 sps:$4 sm:$0xff]   ;;  %v4537_v8 = vld [vmem:[%s6339_s2 + $0x268] ss:$16 sps:$4 sm:$0xff]  }
 0x38b   :  { %1736 = vmatprep.subr.bf16.mxu0 %v4500_v9  ;;  %1779 = vmatprep.subr.bf16.mxu1 %v4503_v11  ;;  %v4545_v9 = vld [vmem:[%s6339_s2 + $0x28c] ss:$16 sps:$4 sm:$0xff]   ;;  %v4543_v11 = vld [vmem:[%s6339_s2 + $0x288] ss:$16 sps:$4 sm:$0xff]  }
 0x38e   :  { %1737 = vmatpush1.bf16.msra.mxu0 %v4498_v38  ;;  %1780 = vmatpush1.bf16.msra.mxu1 %v4501_v39  ;;  %v4542_v38 = vld [vmem:[%s6339_s2 + $0x284] ss:$16 sps:$4 sm:$0xff]   ;;  %v4540_v39 = vld [vmem:[%s6339_s2 + $0x280] ss:$16 sps:$4 sm:$0xff]  }
 0x38f   :  { %1738 = vmatprep.subr.bf16.mxu0 %v4506_v12  ;;  %1781 = vmatprep.subr.bf16.mxu1 %v4509_v13  ;;  %v4548_v12 = vld [vmem:[%s6339_s2 + $0x2a4] ss:$16 sps:$4 sm:$0xff]   ;;  %v4551_v13 = vld [vmem:[%s6339_s2 + $0x2ac] ss:$16 sps:$4 sm:$0xff]  }
 0x392   :  { %1739 = vmatpush1.bf16.msra.mxu0 %v4504_v14  ;;  %1782 = vmatpush1.bf16.msra.mxu1 %v4507_v15  ;;  %v4546_v14 = vld [vmem:[%s6339_s2 + $0x2a0] ss:$16 sps:$4 sm:$0xff]   ;;  %v4549_v15 = vld [vmem:[%s6339_s2 + $0x2a8] ss:$16 sps:$4 sm:$0xff]  }
 0x393   :  { %1740 = vmatprep.subr.bf16.mxu0 %v4512_v16  ;;  %1783 = vmatprep.subr.bf16.mxu1 %v4515_v17  ;;  %v4554_v16 = vld [vmem:[%s6339_s2 + $0x2c4] ss:$16 sps:$4 sm:$0xff]   ;;  %v4557_v17 = vld [vmem:[%s6339_s2 + $0x2cc] ss:$16 sps:$4 sm:$0xff]  }
 0x396   :  { %1741 = vmatpush1.bf16.msra.mxu0 %v4510_v18  ;;  %1784 = vmatpush1.bf16.msra.mxu1 %v4513_v21  ;;  %v4552_v18 = vld [vmem:[%s6339_s2 + $0x2c0] ss:$16 sps:$4 sm:$0xff]   ;;  %v4555_v21 = vld [vmem:[%s6339_s2 + $0x2c8] ss:$16 sps:$4 sm:$0xff]  }
 0x397   :  { %1972 = vmatprep.subr.bf16.mxu0 %v5619_v24  ;;  %2013 = vmatprep.subr.bf16.mxu1 %v5624_v7 }
 0x44b   :  { %v1396_v25 = vpop.f32.mrb[20].mxu0  ;;  %v1437_v26 = vpop.f32.mrb[20].mxu1 }
 0x44c   :  { %v1444_v10 = vadd.f32 %v1396_v25, %v5503_v4  ;;  %v1446_v27 = vadd.f32 %v1437_v26, %v5505_v5  ;;  %v1398_v28 = vpop.f32.mrb[21].mxu0  ;;  %v1439_v29 = vpop.f32.mrb[21].mxu1  ;;  %v4560_v25 = vld [vmem:[%s6339_s2 + $0x2e4] ss:$16 sps:$4 sm:$0xff]   ;;  %v4563_v26 = vld [vmem:[%s6339_s2 + $0x2ec] ss:$16 sps:$4 sm:$0xff]  }
 0x44d   :  { %v1445_v30 = vadd.f32 %v1398_v28, %v5507_v34  ;;  %v1447_v31 = vadd.f32 %v1439_v29, %v5509_v36  ;;  %v1400_v32 = vpop.f32.mrb[22].mxu0  ;;  %v1441_v33 = vpop.f32.mrb[22].mxu1 }
 0x44e   :  { %v3858_v35 = vmul.f32 -1.442695, %v1444_v10  ;;  %v1401_v37 = vpop.f32.mrb[23].mxu0  ;;  %v1442_v40 = vpop.f32.mrb[23].mxu1  ;;  %v4558_v10 = vld [vmem:[%s6339_s2 + $0x2e0] ss:$16 sps:$4 sm:$0xff]  }
 0x44f   :  { %v3859_v41 = vmul.f32 -1.442695, %v1445_v30  ;;  %v3860_v42 = vmul.f32 -1.442695, %v1447_v31 }
 0x450   :  { %4812 = vpow2.f32 %v3858_v35 }
 0x451   :  { %4814 = vpow2.f32 %v3859_v41 }
 0x452   :  { %4816 = vpow2.f32 %v3860_v42 }
 0x453   :  { %4818 = vtanh.f32 %v1446_v27  ;;  %v4561_v27 = vld [vmem:[%s6339_s2 + $0x2e8] ss:$16 sps:$4 sm:$0xff]  }
 0x45a   :  { %v4813_v43 = vpop.eup %4812 }
 0x45b   :  { %v4815_v45 = vpop.eup %4814  ;;  %v1451_v4 = vadd.f32 1.0, %v4813_v43 }
 0x45c   :  { %v1457_v5 = vadd.f32 1.0, %v4815_v45  ;;  %v4817_v34 = vpop.eup %4816 }
 0x45d   :  { %4820 = vrcp.f32 %v1451_v4  ;;  %v4819_v46 = vpop.eup %4818  ;;  %v1464_v50 = vadd.f32 1.0, %v4817_v34 }
 0x45e   :  { %4822 = vrcp.f32 %v1457_v5 }
 0x45f   :  { %4824 = vrcp.f32 %v1464_v50 }
 0x467   :  { %v4821_v36 = vpop.eup %4820 }
 0x468   :  { %v4823_v48 = vpop.eup %4822  ;;  %v1468_v49 = vmul.f32 %v4821_v36, %v4819_v46 }
 0x469   :  { %v1467_v51 = vmul.f32 %v4823_v48, %v5511_v44  ;;  %v4825_v55 = vpop.eup %4824 }
 0x46b   :  { %v1469_v54 = vadd.f32 %v1468_v49, %v1467_v51 }
 0x46d   :  { %4826 = vtanh.f32 %v1469_v54  ;;  %3862 = vst [vmem:[%s6341_s6 + $0x8] sm:$0xff] %v1469_v54 }
 0x477   :  { %v4827_v56 = vpop.eup %4826 }
 0x478   :  { %v1471_v57 = vmul.f32 %v4827_v56, %v4825_v55 }
 0x47a   :  { %3861 = vst [vmem:[%s6342_s5 + $0x8] sm:$0xff] %v1471_v57  ;;  %v1544_v44 = vpack.c.bf16 %v1471_v57, %v5514_v47  ;;  %v5665_v47 = vld [vmem:[%s6339_s2 + $0x220] ss:$16 sps:$4 sm:$0xff]  }
 0x47c   :  { %1759 = vmatmul.mubr.bf16.vlgmr.msra.gmra.mrb[24].mxu0 %v1544_v44  ;;  %1802 = vmatmul.mubr.bf16.vlgmr.msra.gmra.mrb[24].mxu1 %v1544_v44 }
 0x47d   :  { %1973 = vmatpush1.bf16.msra.mxu0 %v5639_v52  ;;  %2014 = vmatpush1.bf16.msra.mxu1 %v5644_v53 }
 0x47e   :  { %1974 = vmatprep.subr.bf16.mxu0 %v5653_v58  ;;  %2015 = vmatprep.subr.bf16.mxu1 %v5658_v59 }
 0x47f   :  { %2004 = vmatprep.mubr.bf16.mxu0 %v4924_v1  ;;  %2045 = vmatprep.mubr.bf16.mxu1 %v4924_v1 }
 0x481   :  { %1975 = vmatpush1.bf16.msra.mxu0 %v5665_v47  ;;  %2016 = vmatpush1.bf16.msra.mxu1 %v5670_v60 }
 0x482   :  { %1976 = vmatprep.subr.bf16.mxu0 %v5677_v61  ;;  %2017 = vmatprep.subr.bf16.mxu1 %v5682_v62 }
 0x485   :  { %1977 = vmatpush1.bf16.msra.mxu0 %v4528_v63  ;;  %2018 = vmatpush1.bf16.msra.mxu1 %v4531_v0 }
 0x486   :  { %1978 = vmatprep.subr.bf16.mxu0 %v4536_v2  ;;  %2019 = vmatprep.subr.bf16.mxu1 %v4539_v3 }
 0x489   :  { %1979 = vmatpush1.bf16.msra.mxu0 %v4534_v6  ;;  %2020 = vmatpush1.bf16.msra.mxu1 %v4537_v8 }
 0x48a   :  { %1980 = vmatprep.subr.bf16.mxu0 %v4542_v38  ;;  %2021 = vmatprep.subr.bf16.mxu1 %v4545_v9 }
 0x48d   :  { %1981 = vmatpush1.bf16.msra.mxu0 %v4540_v39  ;;  %2022 = vmatpush1.bf16.msra.mxu1 %v4543_v11 }
 0x48e   :  { %1982 = vmatprep.subr.bf16.mxu0 %v4548_v12  ;;  %2023 = vmatprep.subr.bf16.mxu1 %v4551_v13 }
 0x491   :  { %1983 = vmatpush1.bf16.msra.mxu0 %v4546_v14  ;;  %2024 = vmatpush1.bf16.msra.mxu1 %v4549_v15 }
 0x492   :  { %1984 = vmatprep.subr.bf16.mxu0 %v4554_v16  ;;  %2025 = vmatprep.subr.bf16.mxu1 %v4557_v17 }
 0x495   :  { %1985 = vmatpush1.bf16.msra.mxu0 %v4552_v18  ;;  %2026 = vmatpush1.bf16.msra.mxu1 %v4555_v21 }
 0x496   :  { %1986 = vmatprep.subr.bf16.mxu0 %v4560_v25  ;;  %2027 = vmatprep.subr.bf16.mxu1 %v4563_v26 }
 0x499   :  { %1987 = vmatpush1.bf16.msra.mxu0 %v4558_v10  ;;  %2028 = vmatpush1.bf16.msra.mxu1 %v4561_v27 }
 0x49a   :  { %2083 = vmatprep.subr.bf16.mxu0 %v5619_v24  ;;  %2124 = vmatprep.subr.bf16.mxu1 %v5624_v7  ;;  %v3927_v24 = vld [vmem:[%s6340_s3 + $0x8] sm:$0xf] }
 0x49b   :  { %v1549_v29 = vrot.slane %v3927_v24, %v5214_v19  ;;  %v1557_v30 = vrot.slane %v3927_v24, %v5216_v20  ;;  %v1553_v33 = vrot.slane %v3927_v24, %v5223_v23  ;;  %v1561_v35 = vrot.slane %v3927_v24, %v5221_v22  ;;  %v4573_v24 = vld [vmem:[%s6337_s1 + $0x328] ss:$16 sps:$4 sm:$0xff]  }
 0x49c   :  { %2005 = vmatmul.mubr.bf16.vlgmr.msra.gmra.mrb[28].mxu0 %v4924_v1  ;;  %2046 = vmatmul.mubr.bf16.vlgmr.msra.gmra.mrb[28].mxu1 %v4924_v1 }
 0x49d   :  { %2084 = vmatpush1.bf16.msra.mxu0 %v5639_v52  ;;  %2125 = vmatpush1.bf16.msra.mxu1 %v5644_v53 }
 0x49e   :  { %2085 = vmatprep.subr.bf16.mxu0 %v5653_v58  ;;  %2126 = vmatprep.subr.bf16.mxu1 %v5658_v59 }
 0x49f   :  { %2115 = vmatprep.mubr.bf16.mxu0 %v4924_v1  ;;  %2156 = vmatprep.mubr.bf16.mxu1 %v4924_v1 }
 0x4a1   :  { %2086 = vmatpush1.bf16.msra.mxu0 %v5665_v47  ;;  %2127 = vmatpush1.bf16.msra.mxu1 %v5670_v60 }
 0x4a2   :  { %2087 = vmatprep.subr.bf16.mxu0 %v5677_v61  ;;  %2128 = vmatprep.subr.bf16.mxu1 %v5682_v62 }
 0x4a5   :  { %2088 = vmatpush1.bf16.msra.mxu0 %v4528_v63  ;;  %2129 = vmatpush1.bf16.msra.mxu1 %v4531_v0 }
 0x4a6   :  { %2089 = vmatprep.subr.bf16.mxu0 %v4536_v2  ;;  %2130 = vmatprep.subr.bf16.mxu1 %v4539_v3 }
 0x4a9   :  { %2090 = vmatpush1.bf16.msra.mxu0 %v4534_v6  ;;  %2131 = vmatpush1.bf16.msra.mxu1 %v4537_v8 }
 0x4aa   :  { %2091 = vmatprep.subr.bf16.mxu0 %v4542_v38  ;;  %2132 = vmatprep.subr.bf16.mxu1 %v4545_v9 }
 0x4ad   :  { %2092 = vmatpush1.bf16.msra.mxu0 %v4540_v39  ;;  %2133 = vmatpush1.bf16.msra.mxu1 %v4543_v11 }
 0x4ae   :  { %2093 = vmatprep.subr.bf16.mxu0 %v4548_v12  ;;  %2134 = vmatprep.subr.bf16.mxu1 %v4551_v13 }
 0x4b1   :  { %2094 = vmatpush1.bf16.msra.mxu0 %v4546_v14  ;;  %2135 = vmatpush1.bf16.msra.mxu1 %v4549_v15 }
 0x4b2   :  { %2095 = vmatprep.subr.bf16.mxu0 %v4554_v16  ;;  %2136 = vmatprep.subr.bf16.mxu1 %v4557_v17  ;;  %v4566_v17 = vld [vmem:[%s6337_s1 + $0x304] ss:$16 sps:$4 sm:$0xff]  }
 0x4b5   :  { %2096 = vmatpush1.bf16.msra.mxu0 %v4552_v18  ;;  %2137 = vmatpush1.bf16.msra.mxu1 %v4555_v21  ;;  %v4569_v18 = vld [vmem:[%s6337_s1 + $0x30c] ss:$16 sps:$4 sm:$0xff]   ;;  %v4564_v21 = vld [vmem:[%s6337_s1 + $0x300] ss:$16 sps:$4 sm:$0xff]  }
 0x4b6   :  { %2097 = vmatprep.subr.bf16.mxu0 %v4560_v25  ;;  %2138 = vmatprep.subr.bf16.mxu1 %v4563_v26  ;;  %v4567_v25 = vld [vmem:[%s6337_s1 + $0x308] ss:$16 sps:$4 sm:$0xff]   ;;  %v4572_v26 = vld [vmem:[%s6337_s1 + $0x324] ss:$16 sps:$4 sm:$0xff]  }
 0x4b9   :  { %2098 = vmatpush1.bf16.msra.mxu0 %v4558_v10  ;;  %2139 = vmatpush1.bf16.msra.mxu1 %v4561_v27  ;;  %v4575_v10 = vld [vmem:[%s6337_s1 + $0x32c] ss:$16 sps:$4 sm:$0xff]   ;;  %v4570_v27 = vld [vmem:[%s6337_s1 + $0x320] ss:$16 sps:$4 sm:$0xff]  }
 0x4ba   :  { %2447 = vmatprep.subr.bf16.mxu0 %v4566_v17  ;;  %2490 = vmatprep.subr.bf16.mxu1 %v4569_v18 }
 0x54f   :  { %v1760_v7 = vpop.f32.mrb[24].mxu0  ;;  %v1803_v28 = vpop.f32.mrb[24].mxu1 }
 0x550   :  { %v1762_v31 = vpop.f32.mrb[25].mxu0  ;;  %v1805_v32 = vpop.f32.mrb[25].mxu1  ;;  %v1761_v34 = vadd.f32 %v1760_v7, %v1549_v29  ;;  %v1804_v46 = vadd.f32 %v1803_v28, %v1557_v30  ;;  %v4578_v7 = vld [vmem:[%s6337_s1 + $0x344] ss:$16 sps:$4 sm:$0xff]   ;;  %v4581_v28 = vld [vmem:[%s6337_s1 + $0x34c] ss:$16 sps:$4 sm:$0xff]  }
 0x551   :  { %v1764_v37 = vpop.f32.mrb[26].mxu0  ;;  %v1807_v40 = vpop.f32.mrb[26].mxu1  ;;  %v1763_v36 = vadd.f32 %v1762_v31, %v1553_v33  ;;  %v1806_v48 = vadd.f32 %v1805_v32, %v1561_v35  ;;  %v4584_v31 = vld [vmem:[%s6337_s1 + $0x364] ss:$16 sps:$4 sm:$0xff]   ;;  %v4587_v32 = vld [vmem:[%s6337_s1 + $0x36c] ss:$16 sps:$4 sm:$0xff]  }
 0x552   :  { %v5777_v41 = vadd.f32 %v1764_v37, %v1549_v29  ;;  %v5779_v42 = vadd.f32 %v1807_v40, %v1557_v30  ;;  %v1766_v43 = vpop.f32.mrb[27].mxu0  ;;  %v1809_v45 = vpop.f32.mrb[27].mxu1  ;;  %v4576_v29 = vld [vmem:[%s6337_s1 + $0x340] ss:$16 sps:$4 sm:$0xff]   ;;  %v4579_v30 = vld [vmem:[%s6337_s1 + $0x348] ss:$16 sps:$4 sm:$0xff]  }
 0x553   :  { %v5781_v4 = vadd.f32 %v1766_v43, %v1553_v33  ;;  %v5783_v5 = vadd.f32 %v1809_v45, %v1561_v35  ;;  %v4582_v33 = vld [vmem:[%s6337_s1 + $0x360] ss:$16 sps:$4 sm:$0xff]   ;;  %v4585_v35 = vld [vmem:[%s6337_s1 + $0x368] ss:$16 sps:$4 sm:$0xff]   ;;  %v4590_v37 = vld [vmem:[%s6337_s1 + $0x384] ss:$16 sps:$4 sm:$0xff]  }
 0x554   :  { %v4593_v40 = vld [vmem:[%s6337_s1 + $0x38c] ss:$16 sps:$4 sm:$0xff]   ;;  %v4588_v43 = vld [vmem:[%s6337_s1 + $0x380] ss:$16 sps:$4 sm:$0xff]   ;;  %v4591_v45 = vld [vmem:[%s6337_s1 + $0x388] ss:$16 sps:$4 sm:$0xff]  }
 0x56f   :  { %v2006_v49 = vpop.f32.mrb[28].mxu0  ;;  %v2047_v50 = vpop.f32.mrb[28].mxu1 }
 0x570   :  { %v2054_v51 = vadd.f32 %v2006_v49, %v1761_v34  ;;  %v2056_v54 = vadd.f32 %v2047_v50, %v1804_v46  ;;  %v2008_v55 = vpop.f32.mrb[29].mxu0  ;;  %v2049_v56 = vpop.f32.mrb[29].mxu1  ;;  %v4594_v34 = vld [vmem:[%s6337_s1 + $0x3a0] ss:$16 sps:$4 sm:$0xff]   ;;  %v4596_v46 = vld [vmem:[%s6337_s1 + $0x3a4] ss:$16 sps:$4 sm:$0xff]  }
 0x571   :  { %v2055_v57 = vadd.f32 %v2008_v55, %v1763_v36  ;;  %v2057_v52 = vadd.f32 %v2049_v56, %v1806_v48  ;;  %v2010_v53 = vpop.f32.mrb[30].mxu0  ;;  %v2051_v44 = vpop.f32.mrb[30].mxu1  ;;  %v4597_v36 = vld [vmem:[%s6337_s1 + $0x3a8] ss:$16 sps:$4 sm:$0xff]   ;;  %v4599_v48 = vld [vmem:[%s6337_s1 + $0x3ac] ss:$16 sps:$4 sm:$0xff]  }
 0x572   :  { %v3992_v58 = vmul.f32 -1.442695, %v2054_v51  ;;  %v2011_v59 = vpop.f32.mrb[31].mxu0  ;;  %v2052_v47 = vpop.f32.mrb[31].mxu1  ;;  %v4602_v49 = vld [vmem:[%s6337_s1 + $0x3c4] ss:$16 sps:$4 sm:$0xff]  }
 0x573   :  { %v3993_v60 = vmul.f32 -1.442695, %v2055_v57  ;;  %v3994_v61 = vmul.f32 -1.442695, %v2057_v52  ;;  %v4605_v50 = vld [vmem:[%s6337_s1 + $0x3cc] ss:$16 sps:$4 sm:$0xff]  }
 0x574   :  { %4828 = vpow2.f32 %v3992_v58  ;;  %v4600_v51 = vld [vmem:[%s6337_s1 + $0x3c0] ss:$16 sps:$4 sm:$0xff]   ;;  %v4608_v55 = vld [vmem:[%s6337_s1 + $0x3e4] ss:$16 sps:$4 sm:$0xff]   ;;  %v4611_v56 = vld [vmem:[%s6337_s1 + $0x3ec] ss:$16 sps:$4 sm:$0xff]  }
 0x575   :  { %4830 = vpow2.f32 %v3993_v60  ;;  %v4606_v57 = vld [vmem:[%s6337_s1 + $0x3e0] ss:$16 sps:$4 sm:$0xff]   ;;  %v4609_v52 = vld [vmem:[%s6337_s1 + $0x3e8] ss:$16 sps:$4 sm:$0xff]   ;;  %v5893_v53 = vld [vmem:[%s6339_s2 + $0x304] ss:$16 sps:$4 sm:$0xff]  }
 0x576   :  { %4832 = vpow2.f32 %v3994_v61  ;;  %v5898_v44 = vld [vmem:[%s6339_s2 + $0x30c] ss:$16 sps:$4 sm:$0xff]  }
 0x577   :  { %4834 = vtanh.f32 %v2056_v54  ;;  %v4603_v54 = vld [vmem:[%s6337_s1 + $0x3c8] ss:$16 sps:$4 sm:$0xff]  }
 0x57e   :  { %v4829_v62 = vpop.eup %4828 }
 0x57f   :  { %v4831_v63 = vpop.eup %4830  ;;  %v2061_v0 = vadd.f32 1.0, %v4829_v62 }
 0x580   :  { %v2067_v2 = vadd.f32 1.0, %v4831_v63  ;;  %v4833_v3 = vpop.eup %4832 }
 0x581   :  { %4836 = vrcp.f32 %v2061_v0  ;;  %v4835_v6 = vpop.eup %4834  ;;  %v2074_v39 = vadd.f32 1.0, %v4833_v3 }
 0x582   :  { %4838 = vrcp.f32 %v2067_v2 }
 0x583   :  { %4840 = vrcp.f32 %v2074_v39 }
 0x58b   :  { %v4837_v8 = vpop.eup %4836 }
 0x58c   :  { %v4839_v38 = vpop.eup %4838  ;;  %v2078_v9 = vmul.f32 %v4837_v8, %v4835_v6 }
 0x58d   :  { %v2077_v11 = vmul.f32 0.0, %v4839_v38  ;;  %v4841_v13 = vpop.eup %4840 }
 0x58f   :  { %v5785_v12 = vadd.f32 %v2078_v9, %v2077_v11 }
 0x591   :  { %4842 = vtanh.f32 %v5785_v12 }
 0x59b   :  { %v4843_v14 = vpop.eup %4842 }
 0x59c   :  { %v5788_v15 = vmul.f32 %v4843_v14, %v4841_v13 }
 0x59e   :  { %v2082_v16 = vpack.c.bf16 %v5788_v15, %v5788_v15 }
 0x5a0   :  { %2116 = vmatmul.mubr.bf16.vlgmr.msra.gmra.mrb[32].mxu0 %v2082_v16  ;;  %2157 = vmatmul.mubr.bf16.vlgmr.msra.gmra.mrb[32].mxu1 %v2082_v16 }
 0x5a1   :  { %2479 = vmatprep.mubr.bf16.mxu0 %v4924_v1  ;;  %2522 = vmatprep.mubr.bf16.mxu1 %v4924_v1 }
 0x5a2   :  { %2448 = vmatpush1.bf16.msra.mxu0 %v4564_v21  ;;  %2491 = vmatpush1.bf16.msra.mxu1 %v4567_v25 }
 0x5a3   :  { %2449 = vmatprep.subr.bf16.mxu0 %v4572_v26  ;;  %2492 = vmatprep.subr.bf16.mxu1 %v4575_v10 }
 0x5a6   :  { %2450 = vmatpush1.bf16.msra.mxu0 %v4570_v27  ;;  %2493 = vmatpush1.bf16.msra.mxu1 %v4573_v24  ;;  %v5913_v24 = vld [vmem:[%s6339_s2 + $0x300] ss:$16 sps:$4 sm:$0xff]  }
 0x5a7   :  { %2451 = vmatprep.subr.bf16.mxu0 %v4578_v7  ;;  %2494 = vmatprep.subr.bf16.mxu1 %v4581_v28  ;;  %v5918_v7 = vld [vmem:[%s6339_s2 + $0x308] ss:$16 sps:$4 sm:$0xff]   ;;  %v5927_v28 = vld [vmem:[%s6339_s2 + $0x324] ss:$16 sps:$4 sm:$0xff]  }
 0x5aa   :  { %2452 = vmatpush1.bf16.msra.mxu0 %v4576_v29  ;;  %2495 = vmatpush1.bf16.msra.mxu1 %v4579_v30  ;;  %v5932_v29 = vld [vmem:[%s6339_s2 + $0x32c] ss:$16 sps:$4 sm:$0xff]   ;;  %v5944_v30 = vld [vmem:[%s6339_s2 + $0x328] ss:$16 sps:$4 sm:$0xff]  }
 0x5ab   :  { %2453 = vmatprep.subr.bf16.mxu0 %v4584_v31  ;;  %2496 = vmatprep.subr.bf16.mxu1 %v4587_v32  ;;  %v5951_v31 = vld [vmem:[%s6339_s2 + $0x344] ss:$16 sps:$4 sm:$0xff]   ;;  %v5956_v32 = vld [vmem:[%s6339_s2 + $0x34c] ss:$16 sps:$4 sm:$0xff]  }
 0x5ae   :  { %2454 = vmatpush1.bf16.msra.mxu0 %v4582_v33  ;;  %2497 = vmatpush1.bf16.msra.mxu1 %v4585_v35  ;;  %v4624_v33 = vld [vmem:[%s6339_s2 + $0x340] ss:$16 sps:$4 sm:$0xff]   ;;  %v4627_v35 = vld [vmem:[%s6339_s2 + $0x348] ss:$16 sps:$4 sm:$0xff]  }
 0x5af   :  { %2455 = vmatprep.subr.bf16.mxu0 %v4590_v37  ;;  %2498 = vmatprep.subr.bf16.mxu1 %v4593_v40  ;;  %v4632_v37 = vld [vmem:[%s6339_s2 + $0x364] ss:$16 sps:$4 sm:$0xff]   ;;  %v4635_v40 = vld [vmem:[%s6339_s2 + $0x36c] ss:$16 sps:$4 sm:$0xff]  }
 0x5b2   :  { %2456 = vmatpush1.bf16.msra.mxu0 %v4588_v43  ;;  %2499 = vmatpush1.bf16.msra.mxu1 %v4591_v45  ;;  %v4630_v43 = vld [vmem:[%s6339_s2 + $0x360] ss:$16 sps:$4 sm:$0xff]   ;;  %v4633_v45 = vld [vmem:[%s6339_s2 + $0x368] ss:$16 sps:$4 sm:$0xff]  }
 0x5b3   :  { %2457 = vmatprep.subr.bf16.mxu0 %v4596_v46  ;;  %2500 = vmatprep.subr.bf16.mxu1 %v4599_v48  ;;  %v4641_v46 = vld [vmem:[%s6339_s2 + $0x38c] ss:$16 sps:$4 sm:$0xff]   ;;  %v4639_v48 = vld [vmem:[%s6339_s2 + $0x388] ss:$16 sps:$4 sm:$0xff]  }
 0x5b6   :  { %2458 = vmatpush1.bf16.msra.mxu0 %v4594_v34  ;;  %2501 = vmatpush1.bf16.msra.mxu1 %v4597_v36  ;;  %v4638_v34 = vld [vmem:[%s6339_s2 + $0x384] ss:$16 sps:$4 sm:$0xff]   ;;  %v4636_v36 = vld [vmem:[%s6339_s2 + $0x380] ss:$16 sps:$4 sm:$0xff]  }
 0x5b7   :  { %2459 = vmatprep.subr.bf16.mxu0 %v4602_v49  ;;  %2502 = vmatprep.subr.bf16.mxu1 %v4605_v50  ;;  %v4644_v49 = vld [vmem:[%s6339_s2 + $0x3a4] ss:$16 sps:$4 sm:$0xff]   ;;  %v4647_v50 = vld [vmem:[%s6339_s2 + $0x3ac] ss:$16 sps:$4 sm:$0xff]  }
 0x5ba   :  { %2460 = vmatpush1.bf16.msra.mxu0 %v4600_v51  ;;  %2503 = vmatpush1.bf16.msra.mxu1 %v4603_v54  ;;  %v4642_v51 = vld [vmem:[%s6339_s2 + $0x3a0] ss:$16 sps:$4 sm:$0xff]   ;;  %v4645_v54 = vld [vmem:[%s6339_s2 + $0x3a8] ss:$16 sps:$4 sm:$0xff]  }
 0x5bb   :  { %2461 = vmatprep.subr.bf16.mxu0 %v4608_v55  ;;  %2504 = vmatprep.subr.bf16.mxu1 %v4611_v56  ;;  %v4650_v55 = vld [vmem:[%s6339_s2 + $0x3c4] ss:$16 sps:$4 sm:$0xff]   ;;  %v4653_v56 = vld [vmem:[%s6339_s2 + $0x3cc] ss:$16 sps:$4 sm:$0xff]  }
 0x5be   :  { %2462 = vmatpush1.bf16.msra.mxu0 %v4606_v57  ;;  %2505 = vmatpush1.bf16.msra.mxu1 %v4609_v52  ;;  %v4648_v57 = vld [vmem:[%s6339_s2 + $0x3c0] ss:$16 sps:$4 sm:$0xff]   ;;  %v4651_v52 = vld [vmem:[%s6339_s2 + $0x3c8] ss:$16 sps:$4 sm:$0xff]  }
 0x5bf   :  { %2693 = vmatprep.subr.bf16.mxu0 %v5893_v53  ;;  %2734 = vmatprep.subr.bf16.mxu1 %v5898_v44 }
 0x673   :  { %v2117_v58 = vpop.f32.mrb[32].mxu0  ;;  %v2158_v59 = vpop.f32.mrb[32].mxu1 }
 0x674   :  { %v2165_v47 = vadd.f32 %v2117_v58, %v5777_v41  ;;  %v2167_v60 = vadd.f32 %v2158_v59, %v5779_v42  ;;  %v2119_v61 = vpop.f32.mrb[33].mxu0  ;;  %v2160_v62 = vpop.f32.mrb[33].mxu1  ;;  %v4656_v58 = vld [vmem:[%s6339_s2 + $0x3e4] ss:$16 sps:$4 sm:$0xff]   ;;  %v4659_v59 = vld [vmem:[%s6339_s2 + $0x3ec] ss:$16 sps:$4 sm:$0xff]  }
 0x675   :  { %v2166_v63 = vadd.f32 %v2119_v61, %v5781_v4  ;;  %v2168_v0 = vadd.f32 %v2160_v62, %v5783_v5  ;;  %v2121_v2 = vpop.f32.mrb[34].mxu0  ;;  %v2162_v3 = vpop.f32.mrb[34].mxu1 }
 0x676   :  { %v3995_v6 = vmul.f32 -1.442695, %v2165_v47  ;;  %v2122_v8 = vpop.f32.mrb[35].mxu0  ;;  %v2163_v38 = vpop.f32.mrb[35].mxu1  ;;  %v4654_v47 = vld [vmem:[%s6339_s2 + $0x3e0] ss:$16 sps:$4 sm:$0xff]  }
 0x677   :  { %v3996_v9 = vmul.f32 -1.442695, %v2166_v63  ;;  %v3997_v39 = vmul.f32 -1.442695, %v2168_v0 }
 0x678   :  { %4844 = vpow2.f32 %v3995_v6 }
 0x679   :  { %4846 = vpow2.f32 %v3996_v9 }
 0x67a   :  { %4848 = vpow2.f32 %v3997_v39 }
 0x67b   :  { %4850 = vtanh.f32 %v2167_v60  ;;  %v4657_v60 = vld [vmem:[%s6339_s2 + $0x3e8] ss:$16 sps:$4 sm:$0xff]  }
 0x682   :  { %v4845_v11 = vpop.eup %4844 }
 0x683   :  { %v4847_v13 = vpop.eup %4846  ;;  %v2172_v41 = vadd.f32 1.0, %v4845_v11 }
 0x684   :  { %v2178_v42 = vadd.f32 1.0, %v4847_v13  ;;  %v4849_v4 = vpop.eup %4848 }
 0x685   :  { %4852 = vrcp.f32 %v2172_v41  ;;  %v4851_v14 = vpop.eup %4850  ;;  %v2185_v18 = vadd.f32 1.0, %v4849_v4 }
 0x686   :  { %4854 = vrcp.f32 %v2178_v42 }
 0x687   :  { %4856 = vrcp.f32 %v2185_v18 }
 0x68f   :  { %v4853_v5 = vpop.eup %4852 }
 0x690   :  { %v4855_v16 = vpop.eup %4854  ;;  %v2189_v17 = vmul.f32 %v4853_v5, %v4851_v14 }
 0x691   :  { %v2188_v21 = vmul.f32 %v4855_v16, %v5785_v12  ;;  %v4857_v26 = vpop.eup %4856 }
 0x693   :  { %v2190_v25 = vadd.f32 %v2189_v17, %v2188_v21 }
 0x695   :  { %4858 = vtanh.f32 %v2190_v25  ;;  %3999 = vst [vmem:[%s6341_s6 + $0x10] sm:$0xff] %v2190_v25 }
 0x69f   :  { %v4859_v10 = vpop.eup %4858 }
 0x6a0   :  { %v2192_v27 = vmul.f32 %v4859_v10, %v4857_v26 }
 0x6a2   :  { %3998 = vst [vmem:[%s6342_s5 + $0x10] sm:$0xff] %v2192_v27  ;;  %v2265_v12 = vpack.c.bf16 %v2192_v27, %v5788_v15  ;;  %v5939_v15 = vld [vmem:[%s6339_s2 + $0x320] ss:$16 sps:$4 sm:$0xff]  }
 0x6a4   :  { %2480 = vmatmul.mubr.bf16.vlgmr.msra.gmra.mrb[36].mxu0 %v2265_v12  ;;  %2523 = vmatmul.mubr.bf16.vlgmr.msra.gmra.mrb[36].mxu1 %v2265_v12 }
 0x6a5   :  { %2694 = vmatpush1.bf16.msra.mxu0 %v5913_v24  ;;  %2735 = vmatpush1.bf16.msra.mxu1 %v5918_v7 }
 0x6a6   :  { %2695 = vmatprep.subr.bf16.mxu0 %v5927_v28  ;;  %2736 = vmatprep.subr.bf16.mxu1 %v5932_v29 }
 0x6a7   :  { %2725 = vmatprep.mubr.bf16.mxu0 %v4924_v1  ;;  %2766 = vmatprep.mubr.bf16.mxu1 %v4924_v1 }
 0x6a9   :  { %2696 = vmatpush1.bf16.msra.mxu0 %v5939_v15  ;;  %2737 = vmatpush1.bf16.msra.mxu1 %v5944_v30 }
 0x6aa   :  { %2697 = vmatprep.subr.bf16.mxu0 %v5951_v31  ;;  %2738 = vmatprep.subr.bf16.mxu1 %v5956_v32 }
 0x6ad   :  { %2698 = vmatpush1.bf16.msra.mxu0 %v4624_v33  ;;  %2739 = vmatpush1.bf16.msra.mxu1 %v4627_v35 }
 0x6ae   :  { %2699 = vmatprep.subr.bf16.mxu0 %v4632_v37  ;;  %2740 = vmatprep.subr.bf16.mxu1 %v4635_v40 }
 0x6b1   :  { %2700 = vmatpush1.bf16.msra.mxu0 %v4630_v43  ;;  %2741 = vmatpush1.bf16.msra.mxu1 %v4633_v45 }
 0x6b2   :  { %2701 = vmatprep.subr.bf16.mxu0 %v4638_v34  ;;  %2742 = vmatprep.subr.bf16.mxu1 %v4641_v46 }
 0x6b5   :  { %2702 = vmatpush1.bf16.msra.mxu0 %v4636_v36  ;;  %2743 = vmatpush1.bf16.msra.mxu1 %v4639_v48 }
 0x6b6   :  { %2703 = vmatprep.subr.bf16.mxu0 %v4644_v49  ;;  %2744 = vmatprep.subr.bf16.mxu1 %v4647_v50 }
 0x6b9   :  { %2704 = vmatpush1.bf16.msra.mxu0 %v4642_v51  ;;  %2745 = vmatpush1.bf16.msra.mxu1 %v4645_v54 }
 0x6ba   :  { %2705 = vmatprep.subr.bf16.mxu0 %v4650_v55  ;;  %2746 = vmatprep.subr.bf16.mxu1 %v4653_v56 }
 0x6bd   :  { %2706 = vmatpush1.bf16.msra.mxu0 %v4648_v57  ;;  %2747 = vmatpush1.bf16.msra.mxu1 %v4651_v52 }
 0x6be   :  { %2707 = vmatprep.subr.bf16.mxu0 %v4656_v58  ;;  %2748 = vmatprep.subr.bf16.mxu1 %v4659_v59 }
 0x6c1   :  { %2708 = vmatpush1.bf16.msra.mxu0 %v4654_v47  ;;  %2749 = vmatpush1.bf16.msra.mxu1 %v4657_v60 }
 0x6c2   :  { %2804 = vmatprep.subr.bf16.mxu0 %v5893_v53  ;;  %2845 = vmatprep.subr.bf16.mxu1 %v5898_v44  ;;  %v4064_v53 = vld [vmem:[%s6340_s3 + $0xc] sm:$0xf] }
 0x6c3   :  { %v2270_v62 = vrot.slane %v4064_v53, %v5214_v19  ;;  %v2278_v63 = vrot.slane %v4064_v53, %v5216_v20  ;;  %v2274_v3 = vrot.slane %v4064_v53, %v5223_v23  ;;  %v2282_v6 = vrot.slane %v4064_v53, %v5221_v22  ;;  %v4669_v53 = vld [vmem:[%s6337_s1 + $0x428] ss:$16 sps:$4 sm:$0xff]  }
 0x6c4   :  { %2726 = vmatmul.mubr.bf16.vlgmr.msra.gmra.mrb[40].mxu0 %v4924_v1  ;;  %2767 = vmatmul.mubr.bf16.vlgmr.msra.gmra.mrb[40].mxu1 %v4924_v1 }
 0x6c5   :  { %2805 = vmatpush1.bf16.msra.mxu0 %v5913_v24  ;;  %2846 = vmatpush1.bf16.msra.mxu1 %v5918_v7 }
 0x6c6   :  { %2806 = vmatprep.subr.bf16.mxu0 %v5927_v28  ;;  %2847 = vmatprep.subr.bf16.mxu1 %v5932_v29 }
 0x6c7   :  { %2836 = vmatprep.mubr.bf16.mxu0 %v4924_v1  ;;  %2877 = vmatprep.mubr.bf16.mxu1 %v4924_v1 }
 0x6c9   :  { %2807 = vmatpush1.bf16.msra.mxu0 %v5939_v15  ;;  %2848 = vmatpush1.bf16.msra.mxu1 %v5944_v30 }
 0x6ca   :  { %2808 = vmatprep.subr.bf16.mxu0 %v5951_v31  ;;  %2849 = vmatprep.subr.bf16.mxu1 %v5956_v32 }
 0x6cd   :  { %2809 = vmatpush1.bf16.msra.mxu0 %v4624_v33  ;;  %2850 = vmatpush1.bf16.msra.mxu1 %v4627_v35 }
 0x6ce   :  { %2810 = vmatprep.subr.bf16.mxu0 %v4632_v37  ;;  %2851 = vmatprep.subr.bf16.mxu1 %v4635_v40 }
 0x6d1   :  { %2811 = vmatpush1.bf16.msra.mxu0 %v4630_v43  ;;  %2852 = vmatpush1.bf16.msra.mxu1 %v4633_v45 }
 0x6d2   :  { %2812 = vmatprep.subr.bf16.mxu0 %v4638_v34  ;;  %2853 = vmatprep.subr.bf16.mxu1 %v4641_v46 }
 0x6d5   :  { %2813 = vmatpush1.bf16.msra.mxu0 %v4636_v36  ;;  %2854 = vmatpush1.bf16.msra.mxu1 %v4639_v48 }
 0x6d6   :  { %2814 = vmatprep.subr.bf16.mxu0 %v4644_v49  ;;  %2855 = vmatprep.subr.bf16.mxu1 %v4647_v50 }
 0x6d9   :  { %2815 = vmatpush1.bf16.msra.mxu0 %v4642_v51  ;;  %2856 = vmatpush1.bf16.msra.mxu1 %v4645_v54 }
 0x6da   :  { %2816 = vmatprep.subr.bf16.mxu0 %v4650_v55  ;;  %2857 = vmatprep.subr.bf16.mxu1 %v4653_v56  ;;  %v4662_v56 = vld [vmem:[%s6337_s1 + $0x404] ss:$16 sps:$4 sm:$0xff]  }
 0x6dd   :  { %2817 = vmatpush1.bf16.msra.mxu0 %v4648_v57  ;;  %2858 = vmatpush1.bf16.msra.mxu1 %v4651_v52  ;;  %v4665_v57 = vld [vmem:[%s6337_s1 + $0x40c] ss:$16 sps:$4 sm:$0xff]   ;;  %v4660_v52 = vld [vmem:[%s6337_s1 + $0x400] ss:$16 sps:$4 sm:$0xff]  }
 0x6de   :  { %2818 = vmatprep.subr.bf16.mxu0 %v4656_v58  ;;  %2859 = vmatprep.subr.bf16.mxu1 %v4659_v59  ;;  %v4663_v58 = vld [vmem:[%s6337_s1 + $0x408] ss:$16 sps:$4 sm:$0xff]   ;;  %v4668_v59 = vld [vmem:[%s6337_s1 + $0x424] ss:$16 sps:$4 sm:$0xff]  }
 0x6e1   :  { %2819 = vmatpush1.bf16.msra.mxu0 %v4654_v47  ;;  %2860 = vmatpush1.bf16.msra.mxu1 %v4657_v60  ;;  %v4671_v47 = vld [vmem:[%s6337_s1 + $0x42c] ss:$16 sps:$4 sm:$0xff]   ;;  %v4666_v60 = vld [vmem:[%s6337_s1 + $0x420] ss:$16 sps:$4 sm:$0xff]  }
 0x6e2   :  { %3168 = vmatprep.subr.bf16.mxu0 %v4662_v56  ;;  %3211 = vmatprep.subr.bf16.mxu1 %v4665_v57 }
 0x777   :  { %v2481_v44 = vpop.f32.mrb[36].mxu0  ;;  %v2524_v61 = vpop.f32.mrb[36].mxu1 }
 0x778   :  { %v2483_v0 = vpop.f32.mrb[37].mxu0  ;;  %v2526_v2 = vpop.f32.mrb[37].mxu1  ;;  %v2482_v4 = vadd.f32 %v2481_v44, %v2270_v62  ;;  %v2525_v14 = vadd.f32 %v2524_v61, %v2278_v63  ;;  %v4674_v44 = vld [vmem:[%s6337_s1 + $0x444] ss:$16 sps:$4 sm:$0xff]   ;;  %v4677_v61 = vld [vmem:[%s6337_s1 + $0x44c] ss:$16 sps:$4 sm:$0xff]  }
 0x779   :  { %v2485_v8 = vpop.f32.mrb[38].mxu0  ;;  %v2528_v38 = vpop.f32.mrb[38].mxu1  ;;  %v2484_v5 = vadd.f32 %v2483_v0, %v2274_v3  ;;  %v2527_v16 = vadd.f32 %v2526_v2, %v2282_v6  ;;  %v4680_v0 = vld [vmem:[%s6337_s1 + $0x464] ss:$16 sps:$4 sm:$0xff]   ;;  %v4683_v2 = vld [vmem:[%s6337_s1 + $0x46c] ss:$16 sps:$4 sm:$0xff]  }
 0x77a   :  { %v6051_v9 = vadd.f32 %v2485_v8, %v2270_v62  ;;  %v6053_v39 = vadd.f32 %v2528_v38, %v2278_v63  ;;  %v2487_v11 = vpop.f32.mrb[39].mxu0  ;;  %v2530_v13 = vpop.f32.mrb[39].mxu1  ;;  %v4672_v62 = vld [vmem:[%s6337_s1 + $0x440] ss:$16 sps:$4 sm:$0xff]   ;;  %v4675_v63 = vld [vmem:[%s6337_s1 + $0x448] ss:$16 sps:$4 sm:$0xff]  }
 0x77b   :  { %v6055_v41 = vadd.f32 %v2487_v11, %v2274_v3  ;;  %v6057_v42 = vadd.f32 %v2530_v13, %v2282_v6  ;;  %v4678_v3 = vld [vmem:[%s6337_s1 + $0x460] ss:$16 sps:$4 sm:$0xff]   ;;  %v4681_v6 = vld [vmem:[%s6337_s1 + $0x468] ss:$16 sps:$4 sm:$0xff]   ;;  %v4686_v8 = vld [vmem:[%s6337_s1 + $0x484] ss:$16 sps:$4 sm:$0xff]  }
 0x77c   :  { %v4689_v38 = vld [vmem:[%s6337_s1 + $0x48c] ss:$16 sps:$4 sm:$0xff]   ;;  %v4684_v11 = vld [vmem:[%s6337_s1 + $0x480] ss:$16 sps:$4 sm:$0xff]   ;;  %v4687_v13 = vld [vmem:[%s6337_s1 + $0x488] ss:$16 sps:$4 sm:$0xff]  }
 0x797   :  { %v2727_v17 = vpop.f32.mrb[40].mxu0  ;;  %v2768_v18 = vpop.f32.mrb[40].mxu1 }
 0x798   :  { %v2775_v21 = vadd.f32 %v2727_v17, %v2482_v4  ;;  %v2777_v25 = vadd.f32 %v2768_v18, %v2525_v14  ;;  %v2729_v26 = vpop.f32.mrb[41].mxu0  ;;  %v2770_v10 = vpop.f32.mrb[41].mxu1  ;;  %v4690_v4 = vld [vmem:[%s6337_s1 + $0x4a0] ss:$16 sps:$4 sm:$0xff]   ;;  %v4692_v14 = vld [vmem:[%s6337_s1 + $0x4a4] ss:$16 sps:$4 sm:$0xff]  }
 0x799   :  { %v2776_v27 = vadd.f32 %v2729_v26, %v2484_v5  ;;  %v2778_v24 = vadd.f32 %v2770_v10, %v2527_v16  ;;  %v2731_v7 = vpop.f32.mrb[42].mxu0  ;;  %v2772_v12 = vpop.f32.mrb[42].mxu1  ;;  %v4693_v5 = vld [vmem:[%s6337_s1 + $0x4a8] ss:$16 sps:$4 sm:$0xff]   ;;  %v4695_v16 = vld [vmem:[%s6337_s1 + $0x4ac] ss:$16 sps:$4 sm:$0xff]  }
 0x79a   :  { %v4129_v28 = vmul.f32 -1.442695, %v2775_v21  ;;  %v2732_v29 = vpop.f32.mrb[43].mxu0  ;;  %v2773_v15 = vpop.f32.mrb[43].mxu1  ;;  %v4698_v17 = vld [vmem:[%s6337_s1 + $0x4c4] ss:$16 sps:$4 sm:$0xff]  }
 0x79b   :  { %v4130_v30 = vmul.f32 -1.442695, %v2776_v27  ;;  %v4131_v31 = vmul.f32 -1.442695, %v2778_v24  ;;  %v4701_v18 = vld [vmem:[%s6337_s1 + $0x4cc] ss:$16 sps:$4 sm:$0xff]  }
 0x79c   :  { %4860 = vpow2.f32 %v4129_v28  ;;  %v4696_v21 = vld [vmem:[%s6337_s1 + $0x4c0] ss:$16 sps:$4 sm:$0xff]   ;;  %v4704_v26 = vld [vmem:[%s6337_s1 + $0x4e4] ss:$16 sps:$4 sm:$0xff]   ;;  %v4707_v10 = vld [vmem:[%s6337_s1 + $0x4ec] ss:$16 sps:$4 sm:$0xff]  }
 0x79d   :  { %4862 = vpow2.f32 %v4130_v30  ;;  %v4702_v27 = vld [vmem:[%s6337_s1 + $0x4e0] ss:$16 sps:$4 sm:$0xff]   ;;  %v4705_v24 = vld [vmem:[%s6337_s1 + $0x4e8] ss:$16 sps:$4 sm:$0xff]   ;;  %v6167_v7 = vld [vmem:[%s6339_s2 + $0x404] ss:$16 sps:$4 sm:$0xff]  }
 0x79e   :  { %4864 = vpow2.f32 %v4131_v31  ;;  %v6172_v12 = vld [vmem:[%s6339_s2 + $0x40c] ss:$16 sps:$4 sm:$0xff]  }
 0x79f   :  { %4866 = vtanh.f32 %v2777_v25  ;;  %v4699_v25 = vld [vmem:[%s6337_s1 + $0x4c8] ss:$16 sps:$4 sm:$0xff]  }
 0x7a6   :  { %v4861_v32 = vpop.eup %4860 }
 0x7a7   :  { %v4863_v33 = vpop.eup %4862  ;;  %v2782_v35 = vadd.f32 1.0, %v4861_v32 }
 0x7a8   :  { %v2788_v37 = vadd.f32 1.0, %v4863_v33  ;;  %v4865_v40 = vpop.eup %4864 }
 0x7a9   :  { %4868 = vrcp.f32 %v2782_v35  ;;  %v4867_v43 = vpop.eup %4866  ;;  %v2795_v36 = vadd.f32 1.0, %v4865_v40 }
 0x7aa   :  { %4870 = vrcp.f32 %v2788_v37 }
 0x7ab   :  { %4872 = vrcp.f32 %v2795_v36 }
 0x7b3   :  { %v4869_v45 = vpop.eup %4868 }
 0x7b4   :  { %v4871_v34 = vpop.eup %4870  ;;  %v2799_v46 = vmul.f32 %v4869_v45, %v4867_v43 }
 0x7b5   :  { %v2798_v48 = vmul.f32 0.0, %v4871_v34  ;;  %v4873_v50 = vpop.eup %4872 }
 0x7b7   :  { %v6059_v49 = vadd.f32 %v2799_v46, %v2798_v48 }
 0x7b9   :  { %4874 = vtanh.f32 %v6059_v49 }
 0x7c3   :  { %v4875_v51 = vpop.eup %4874 }
 0x7c4   :  { %v6062_v54 = vmul.f32 %v4875_v51, %v4873_v50 }
 0x7c6   :  { %v2803_v55 = vpack.c.bf16 %v6062_v54, %v6062_v54 }
 0x7c8   :  { %2837 = vmatmul.mubr.bf16.vlgmr.msra.gmra.mrb[44].mxu0 %v2803_v55  ;;  %2878 = vmatmul.mubr.bf16.vlgmr.msra.gmra.mrb[44].mxu1 %v2803_v55 }
 0x7c9   :  { %3200 = vmatprep.mubr.bf16.mxu0 %v4924_v1  ;;  %3243 = vmatprep.mubr.bf16.mxu1 %v4924_v1 }
 0x7ca   :  { %3169 = vmatpush1.bf16.msra.mxu0 %v4660_v52  ;;  %3212 = vmatpush1.bf16.msra.mxu1 %v4663_v58 }
 0x7cb   :  { %3170 = vmatprep.subr.bf16.mxu0 %v4668_v59  ;;  %3213 = vmatprep.subr.bf16.mxu1 %v4671_v47 }
 0x7ce   :  { %3171 = vmatpush1.bf16.msra.mxu0 %v4666_v60  ;;  %3214 = vmatpush1.bf16.msra.mxu1 %v4669_v53  ;;  %v6187_v53 = vld [vmem:[%s6339_s2 + $0x400] ss:$16 sps:$4 sm:$0xff]  }
 0x7cf   :  { %3172 = vmatprep.subr.bf16.mxu0 %v4674_v44  ;;  %3215 = vmatprep.subr.bf16.mxu1 %v4677_v61  ;;  %v6192_v44 = vld [vmem:[%s6339_s2 + $0x408] ss:$16 sps:$4 sm:$0xff]   ;;  %v6201_v61 = vld [vmem:[%s6339_s2 + $0x424] ss:$16 sps:$4 sm:$0xff]  }
 0x7d2   :  { %3173 = vmatpush1.bf16.msra.mxu0 %v4672_v62  ;;  %3216 = vmatpush1.bf16.msra.mxu1 %v4675_v63  ;;  %v6206_v62 = vld [vmem:[%s6339_s2 + $0x42c] ss:$16 sps:$4 sm:$0xff]   ;;  %v6218_v63 = vld [vmem:[%s6339_s2 + $0x428] ss:$16 sps:$4 sm:$0xff]  }
 0x7d3   :  { %3174 = vmatprep.subr.bf16.mxu0 %v4680_v0  ;;  %3217 = vmatprep.subr.bf16.mxu1 %v4683_v2  ;;  %v6225_v0 = vld [vmem:[%s6339_s2 + $0x444] ss:$16 sps:$4 sm:$0xff]   ;;  %v6230_v2 = vld [vmem:[%s6339_s2 + $0x44c] ss:$16 sps:$4 sm:$0xff]  }
 0x7d6   :  { %3175 = vmatpush1.bf16.msra.mxu0 %v4678_v3  ;;  %3218 = vmatpush1.bf16.msra.mxu1 %v4681_v6  ;;  %v4720_v3 = vld [vmem:[%s6339_s2 + $0x440] ss:$16 sps:$4 sm:$0xff]   ;;  %v4723_v6 = vld [vmem:[%s6339_s2 + $0x448] ss:$16 sps:$4 sm:$0xff]  }
 0x7d7   :  { %3176 = vmatprep.subr.bf16.mxu0 %v4686_v8  ;;  %3219 = vmatprep.subr.bf16.mxu1 %v4689_v38  ;;  %v4728_v8 = vld [vmem:[%s6339_s2 + $0x464] ss:$16 sps:$4 sm:$0xff]   ;;  %v4731_v38 = vld [vmem:[%s6339_s2 + $0x46c] ss:$16 sps:$4 sm:$0xff]  }
 0x7da   :  { %3177 = vmatpush1.bf16.msra.mxu0 %v4684_v11  ;;  %3220 = vmatpush1.bf16.msra.mxu1 %v4687_v13  ;;  %v4726_v11 = vld [vmem:[%s6339_s2 + $0x460] ss:$16 sps:$4 sm:$0xff]   ;;  %v4729_v13 = vld [vmem:[%s6339_s2 + $0x468] ss:$16 sps:$4 sm:$0xff]  }
 0x7db   :  { %3178 = vmatprep.subr.bf16.mxu0 %v4692_v14  ;;  %3221 = vmatprep.subr.bf16.mxu1 %v4695_v16  ;;  %v4737_v14 = vld [vmem:[%s6339_s2 + $0x48c] ss:$16 sps:$4 sm:$0xff]   ;;  %v4735_v16 = vld [vmem:[%s6339_s2 + $0x488] ss:$16 sps:$4 sm:$0xff]  }
 0x7de   :  { %3179 = vmatpush1.bf16.msra.mxu0 %v4690_v4  ;;  %3222 = vmatpush1.bf16.msra.mxu1 %v4693_v5  ;;  %v4734_v4 = vld [vmem:[%s6339_s2 + $0x484] ss:$16 sps:$4 sm:$0xff]   ;;  %v4732_v5 = vld [vmem:[%s6339_s2 + $0x480] ss:$16 sps:$4 sm:$0xff]  }
 0x7df   :  { %3180 = vmatprep.subr.bf16.mxu0 %v4698_v17  ;;  %3223 = vmatprep.subr.bf16.mxu1 %v4701_v18  ;;  %v4740_v17 = vld [vmem:[%s6339_s2 + $0x4a4] ss:$16 sps:$4 sm:$0xff]   ;;  %v4743_v18 = vld [vmem:[%s6339_s2 + $0x4ac] ss:$16 sps:$4 sm:$0xff]  }
 0x7e2   :  { %3181 = vmatpush1.bf16.msra.mxu0 %v4696_v21  ;;  %3224 = vmatpush1.bf16.msra.mxu1 %v4699_v25  ;;  %v4738_v21 = vld [vmem:[%s6339_s2 + $0x4a0] ss:$16 sps:$4 sm:$0xff]   ;;  %v4741_v25 = vld [vmem:[%s6339_s2 + $0x4a8] ss:$16 sps:$4 sm:$0xff]  }
 0x7e3   :  { %3182 = vmatprep.subr.bf16.mxu0 %v4704_v26  ;;  %3225 = vmatprep.subr.bf16.mxu1 %v4707_v10  ;;  %v4746_v26 = vld [vmem:[%s6339_s2 + $0x4c4] ss:$16 sps:$4 sm:$0xff]   ;;  %v4749_v10 = vld [vmem:[%s6339_s2 + $0x4cc] ss:$16 sps:$4 sm:$0xff]  }
 0x7e6   :  { %3183 = vmatpush1.bf16.msra.mxu0 %v4702_v27  ;;  %3226 = vmatpush1.bf16.msra.mxu1 %v4705_v24  ;;  %v4744_v27 = vld [vmem:[%s6339_s2 + $0x4c0] ss:$16 sps:$4 sm:$0xff]   ;;  %v4747_v24 = vld [vmem:[%s6339_s2 + $0x4c8] ss:$16 sps:$4 sm:$0xff]  }
 0x7e7   :  { %3414 = vmatprep.subr.bf16.mxu0 %v6167_v7  ;;  %3455 = vmatprep.subr.bf16.mxu1 %v6172_v12 }
 0x89b   :  { %v2838_v28 = vpop.f32.mrb[44].mxu0  ;;  %v2879_v29 = vpop.f32.mrb[44].mxu1 }
 0x89c   :  { %v2886_v15 = vadd.f32 %v2838_v28, %v6051_v9  ;;  %v2888_v30 = vadd.f32 %v2879_v29, %v6053_v39  ;;  %v2840_v31 = vpop.f32.mrb[45].mxu0  ;;  %v2881_v32 = vpop.f32.mrb[45].mxu1  ;;  %v4752_v28 = vld [vmem:[%s6339_s2 + $0x4e4] ss:$16 sps:$4 sm:$0xff]   ;;  %v4755_v29 = vld [vmem:[%s6339_s2 + $0x4ec] ss:$16 sps:$4 sm:$0xff]  }
 0x89d   :  { %v2887_v33 = vadd.f32 %v2840_v31, %v6055_v41  ;;  %v2889_v35 = vadd.f32 %v2881_v32, %v6057_v42  ;;  %v2842_v37 = vpop.f32.mrb[46].mxu0  ;;  %v2883_v40 = vpop.f32.mrb[46].mxu1 }
 0x89e   :  { %v4132_v43 = vmul.f32 -1.442695, %v2886_v15  ;;  %v2843_v45 = vpop.f32.mrb[47].mxu0  ;;  %v2884_v34 = vpop.f32.mrb[47].mxu1  ;;  %v4750_v15 = vld [vmem:[%s6339_s2 + $0x4e0] ss:$16 sps:$4 sm:$0xff]  }
 0x89f   :  { %v4133_v46 = vmul.f32 -1.442695, %v2887_v33  ;;  %v4134_v36 = vmul.f32 -1.442695, %v2889_v35 }
 0x8a0   :  { %4876 = vpow2.f32 %v4132_v43 }
 0x8a1   :  { %4878 = vpow2.f32 %v4133_v46 }
 0x8a2   :  { %4880 = vpow2.f32 %v4134_v36 }
 0x8a3   :  { %4882 = vtanh.f32 %v2888_v30  ;;  %v4753_v30 = vld [vmem:[%s6339_s2 + $0x4e8] ss:$16 sps:$4 sm:$0xff]  }
 0x8aa   :  { %v4877_v48 = vpop.eup %4876 }
 0x8ab   :  { %v4879_v50 = vpop.eup %4878  ;;  %v2893_v9 = vadd.f32 1.0, %v4877_v48 }
 0x8ac   :  { %v2899_v39 = vadd.f32 1.0, %v4879_v50  ;;  %v4881_v41 = vpop.eup %4880 }
 0x8ad   :  { %4884 = vrcp.f32 %v2893_v9  ;;  %v4883_v51 = vpop.eup %4882  ;;  %v2906_v57 = vadd.f32 1.0, %v4881_v41 }
 0x8ae   :  { %4886 = vrcp.f32 %v2899_v39 }
 0x8af   :  { %4888 = vrcp.f32 %v2906_v57 }
 0x8b7   :  { %v4885_v42 = vpop.eup %4884 }
 0x8b8   :  { %v4887_v55 = vpop.eup %4886  ;;  %v2910_v56 = vmul.f32 %v4885_v42, %v4883_v51 }
 0x8b9   :  { %v2909_v52 = vmul.f32 %v4887_v55, %v6059_v49  ;;  %v4889_v59 = vpop.eup %4888 }
 0x8bb   :  { %v2911_v58 = vadd.f32 %v2910_v56, %v2909_v52 }
 0x8bd   :  { %4890 = vtanh.f32 %v2911_v58  ;;  %4136 = vst [vmem:[%s6341_s6 + $0x18] sm:$0xff] %v2911_v58 }
 0x8c7   :  { %v4891_v47 = vpop.eup %4890 }
 0x8c8   :  { %v2913_v60 = vmul.f32 %v4891_v47, %v4889_v59 }
 0x8ca   :  { %4135 = vst [vmem:[%s6342_s5 + $0x18] sm:$0xff] %v2913_v60  ;;  %v2986_v49 = vpack.c.bf16 %v2913_v60, %v6062_v54  ;;  %v6213_v54 = vld [vmem:[%s6339_s2 + $0x420] ss:$16 sps:$4 sm:$0xff]  }
 0x8cc   :  { %3201 = vmatmul.mubr.bf16.vlgmr.msra.gmra.mrb[48].mxu0 %v2986_v49  ;;  %3244 = vmatmul.mubr.bf16.vlgmr.msra.gmra.mrb[48].mxu1 %v2986_v49 }
 0x8cd   :  { %3415 = vmatpush1.bf16.msra.mxu0 %v6187_v53  ;;  %3456 = vmatpush1.bf16.msra.mxu1 %v6192_v44 }
 0x8ce   :  { %3416 = vmatprep.subr.bf16.mxu0 %v6201_v61  ;;  %3457 = vmatprep.subr.bf16.mxu1 %v6206_v62 }
 0x8cf   :  { %3446 = vmatprep.mubr.bf16.mxu0 %v4924_v1  ;;  %3487 = vmatprep.mubr.bf16.mxu1 %v4924_v1 }
 0x8d1   :  { %3417 = vmatpush1.bf16.msra.mxu0 %v6213_v54  ;;  %3458 = vmatpush1.bf16.msra.mxu1 %v6218_v63 }
 0x8d2   :  { %3418 = vmatprep.subr.bf16.mxu0 %v6225_v0  ;;  %3459 = vmatprep.subr.bf16.mxu1 %v6230_v2 }
 0x8d5   :  { %3419 = vmatpush1.bf16.msra.mxu0 %v4720_v3  ;;  %3460 = vmatpush1.bf16.msra.mxu1 %v4723_v6 }
 0x8d6   :  { %3420 = vmatprep.subr.bf16.mxu0 %v4728_v8  ;;  %3461 = vmatprep.subr.bf16.mxu1 %v4731_v38 }
 0x8d9   :  { %3421 = vmatpush1.bf16.msra.mxu0 %v4726_v11  ;;  %3462 = vmatpush1.bf16.msra.mxu1 %v4729_v13 }
 0x8da   :  { %3422 = vmatprep.subr.bf16.mxu0 %v4734_v4  ;;  %3463 = vmatprep.subr.bf16.mxu1 %v4737_v14 }
 0x8dd   :  { %3423 = vmatpush1.bf16.msra.mxu0 %v4732_v5  ;;  %3464 = vmatpush1.bf16.msra.mxu1 %v4735_v16 }
 0x8de   :  { %3424 = vmatprep.subr.bf16.mxu0 %v4740_v17  ;;  %3465 = vmatprep.subr.bf16.mxu1 %v4743_v18 }
 0x8e1   :  { %3425 = vmatpush1.bf16.msra.mxu0 %v4738_v21  ;;  %3466 = vmatpush1.bf16.msra.mxu1 %v4741_v25 }
 0x8e2   :  { %3426 = vmatprep.subr.bf16.mxu0 %v4746_v26  ;;  %3467 = vmatprep.subr.bf16.mxu1 %v4749_v10 }
 0x8e5   :  { %3427 = vmatpush1.bf16.msra.mxu0 %v4744_v27  ;;  %3468 = vmatpush1.bf16.msra.mxu1 %v4747_v24 }
 0x8e6   :  { %3428 = vmatprep.subr.bf16.mxu0 %v4752_v28  ;;  %3469 = vmatprep.subr.bf16.mxu1 %v4755_v29 }
 0x8e9   :  { %3429 = vmatpush1.bf16.msra.mxu0 %v4750_v15  ;;  %3470 = vmatpush1.bf16.msra.mxu1 %v4753_v30 }
 0x8ea   :  { %3526 = vmatprep.subr.bf16.mxu0 %v6167_v7  ;;  %3567 = vmatprep.subr.bf16.mxu1 %v6172_v12 }
 0x8ec   :  { %3447 = vmatmul.mubr.bf16.vlgmr.msra.gmra.mrb[52].mxu0 %v4924_v1  ;;  %3488 = vmatmul.mubr.bf16.vlgmr.msra.gmra.mrb[52].mxu1 %v4924_v1 }
 0x8ed   :  { %3527 = vmatpush1.bf16.msra.mxu0 %v6187_v53  ;;  %3568 = vmatpush1.bf16.msra.mxu1 %v6192_v44 }
 0x8ee   :  { %3528 = vmatprep.subr.bf16.mxu0 %v6201_v61  ;;  %3569 = vmatprep.subr.bf16.mxu1 %v6206_v62 }
 0x8ef   :  { %3558 = vmatprep.mubr.bf16.mxu0 %v4924_v1  ;;  %3599 = vmatprep.mubr.bf16.mxu1 %v4924_v1  ;;  %v4201_v1 = vld [vmem:[%s6340_s3 + $0x10] sm:$0xf] }
 0x8f0   :  { %v2991_v31 = vrot.slane %v4201_v1, %v5214_v19  ;;  %v2999_v32 = vrot.slane %v4201_v1, %v5216_v20  ;;  %v2995_v37 = vrot.slane %v4201_v1, %v5223_v23  ;;  %v3003_v40 = vrot.slane %v4201_v1, %v5221_v22 }
 0x8f1   :  { %3529 = vmatpush1.bf16.msra.mxu0 %v6213_v54  ;;  %3570 = vmatpush1.bf16.msra.mxu1 %v6218_v63 }
 0x8f2   :  { %3530 = vmatprep.subr.bf16.mxu0 %v6225_v0  ;;  %3571 = vmatprep.subr.bf16.mxu1 %v6230_v2 }
 0x8f5   :  { %3531 = vmatpush1.bf16.msra.mxu0 %v4720_v3  ;;  %3572 = vmatpush1.bf16.msra.mxu1 %v4723_v6 }
 0x8f6   :  { %3532 = vmatprep.subr.bf16.mxu0 %v4728_v8  ;;  %3573 = vmatprep.subr.bf16.mxu1 %v4731_v38 }
 0x8f9   :  { %3533 = vmatpush1.bf16.msra.mxu0 %v4726_v11  ;;  %3574 = vmatpush1.bf16.msra.mxu1 %v4729_v13 }
 0x8fa   :  { %3534 = vmatprep.subr.bf16.mxu0 %v4734_v4  ;;  %3575 = vmatprep.subr.bf16.mxu1 %v4737_v14 }
 0x8fd   :  { %3535 = vmatpush1.bf16.msra.mxu0 %v4732_v5  ;;  %3576 = vmatpush1.bf16.msra.mxu1 %v4735_v16 }
 0x8fe   :  { %3536 = vmatprep.subr.bf16.mxu0 %v4740_v17  ;;  %3577 = vmatprep.subr.bf16.mxu1 %v4743_v18 }
 0x901   :  { %3537 = vmatpush1.bf16.msra.mxu0 %v4738_v21  ;;  %3578 = vmatpush1.bf16.msra.mxu1 %v4741_v25 }
 0x902   :  { %3538 = vmatprep.subr.bf16.mxu0 %v4746_v26  ;;  %3579 = vmatprep.subr.bf16.mxu1 %v4749_v10 }
 0x905   :  { %3539 = vmatpush1.bf16.msra.mxu0 %v4744_v27  ;;  %3580 = vmatpush1.bf16.msra.mxu1 %v4747_v24 }
 0x906   :  { %3540 = vmatprep.subr.bf16.mxu0 %v4752_v28  ;;  %3581 = vmatprep.subr.bf16.mxu1 %v4755_v29 }
 0x909   :  { %3541 = vmatpush1.bf16.msra.mxu0 %v4750_v15  ;;  %3582 = vmatpush1.bf16.msra.mxu1 %v4753_v30 }
 0x99f   :  { %v3202_v7 = vpop.f32.mrb[48].mxu0  ;;  %v3245_v12 = vpop.f32.mrb[48].mxu1 }
 0x9a0   :  { %v3204_v33 = vpop.f32.mrb[49].mxu0  ;;  %v3247_v35 = vpop.f32.mrb[49].mxu1  ;;  %v3203_v39 = vadd.f32 %v3202_v7, %v2991_v31  ;;  %v3246_v41 = vadd.f32 %v3245_v12, %v2999_v32 }
 0x9a1   :  { %v3206_v43 = vpop.f32.mrb[50].mxu0  ;;  %v3249_v45 = vpop.f32.mrb[50].mxu1  ;;  %v3205_v51 = vadd.f32 %v3204_v33, %v2995_v37  ;;  %v3248_v19 = vadd.f32 %v3247_v35, %v3003_v40 }
 0x9a2   :  { %v3207_v34 = vadd.f32 %v3206_v43, %v2991_v31  ;;  %v3250_v46 = vadd.f32 %v3249_v45, %v2999_v32  ;;  %v3208_v36 = vpop.f32.mrb[51].mxu0  ;;  %v3251_v48 = vpop.f32.mrb[51].mxu1 }
 0x9a3   :  { %v3209_v50 = vadd.f32 %v3208_v36, %v2995_v37  ;;  %v3252_v9 = vadd.f32 %v3251_v48, %v3003_v40 }
 0x9bf   :  { %v3448_v42 = vpop.f32.mrb[52].mxu0  ;;  %v3489_v20 = vpop.f32.mrb[52].mxu1 }
 0x9c0   :  { %v3496_v55 = vadd.f32 %v3448_v42, %v3203_v39  ;;  %v3498_v56 = vadd.f32 %v3489_v20, %v3246_v41  ;;  %v3450_v57 = vpop.f32.mrb[53].mxu0  ;;  %v3491_v23 = vpop.f32.mrb[53].mxu1 }
 0x9c1   :  { %v3497_v52 = vadd.f32 %v3450_v57, %v3205_v51  ;;  %v3499_v22 = vadd.f32 %v3491_v23, %v3248_v19  ;;  %v3452_v58 = vpop.f32.mrb[54].mxu0  ;;  %v3493_v59 = vpop.f32.mrb[54].mxu1 }
 0x9c2   :  { %v4266_v47 = vmul.f32 -1.442695, %v3496_v55  ;;  %v3453_v60 = vpop.f32.mrb[55].mxu0  ;;  %v3494_v53 = vpop.f32.mrb[55].mxu1 }
 0x9c3   :  { %v4267_v44 = vmul.f32 -1.442695, %v3497_v52  ;;  %v4268_v49 = vmul.f32 -1.442695, %v3499_v22 }
 0x9c4   :  { %4892 = vpow2.f32 %v4266_v47 }
 0x9c5   :  { %4894 = vpow2.f32 %v4267_v44 }
 0x9c6   :  { %4896 = vpow2.f32 %v4268_v49 }
 0x9c7   :  { %4898 = vtanh.f32 %v3498_v56 }
 0x9ce   :  { %v4893_v61 = vpop.eup %4892 }
 0x9cf   :  { %v4895_v62 = vpop.eup %4894  ;;  %v3503_v54 = vadd.f32 1.0, %v4893_v61 }
 0x9d0   :  { %v3509_v63 = vadd.f32 1.0, %v4895_v62  ;;  %v4897_v0 = vpop.eup %4896 }
 0x9d1   :  { %4900 = vrcp.f32 %v3503_v54  ;;  %v4899_v2 = vpop.eup %4898  ;;  %v3516_v38 = vadd.f32 1.0, %v4897_v0 }
 0x9d2   :  { %4902 = vrcp.f32 %v3509_v63 }
 0x9d3   :  { %4904 = vrcp.f32 %v3516_v38 }
 0x9db   :  { %v4901_v3 = vpop.eup %4900 }
 0x9dc   :  { %v4903_v6 = vpop.eup %4902  ;;  %v3520_v8 = vmul.f32 %v4901_v3, %v4899_v2 }
 0x9dd   :  { %v3519_v11 = vmul.f32 0.0, %v4903_v6  ;;  %v4905_v4 = vpop.eup %4904 }
 0x9df   :  { %v3521_v13 = vadd.f32 %v3520_v8, %v3519_v11 }
 0x9e1   :  { %4906 = vtanh.f32 %v3521_v13 }
 0x9eb   :  { %v4907_v14 = vpop.eup %4906 }
 0x9ec   :  { %v3523_v5 = vmul.f32 %v4907_v14, %v4905_v4 }
 0x9ee   :  { %3524 = vst [vmem:[%s6343_s4] sm:$0xff] %v3523_v5  ;;  %v3525_v16 = vpack.c.bf16 %v3523_v5, %v3523_v5 }
 0x9f0   :  { %3559 = vmatmul.mubr.bf16.vlgmr.msra.gmra.mrb[56].mxu0 %v3525_v16  ;;  %3600 = vmatmul.mubr.bf16.vlgmr.msra.gmra.mrb[56].mxu1 %v3525_v16 }
 0xac3   :  { %v3560_v17 = vpop.f32.mrb[56].mxu0  ;;  %v3601_v18 = vpop.f32.mrb[56].mxu1 }
 0xac4   :  { %v3608_v21 = vadd.f32 %v3560_v17, %v3207_v34  ;;  %v3610_v25 = vadd.f32 %v3601_v18, %v3250_v46  ;;  %v3562_v26 = vpop.f32.mrb[57].mxu0  ;;  %v3603_v10 = vpop.f32.mrb[57].mxu1 }
 0xac5   :  { %v3609_v27 = vadd.f32 %v3562_v26, %v3209_v50  ;;  %v3611_v24 = vadd.f32 %v3603_v10, %v3252_v9  ;;  %v3564_v28 = vpop.f32.mrb[58].mxu0  ;;  %v3605_v29 = vpop.f32.mrb[58].mxu1 }
 0xac6   :  { %v4269_v15 = vmul.f32 -1.442695, %v3608_v21  ;;  %v3565_v30 = vpop.f32.mrb[59].mxu0  ;;  %v3606_v1 = vpop.f32.mrb[59].mxu1 }
 0xac7   :  { %v4270_v7 = vmul.f32 -1.442695, %v3609_v27  ;;  %v4271_v12 = vmul.f32 -1.442695, %v3611_v24 }
 0xac8   :  { %4908 = vpow2.f32 %v4269_v15 }
 0xac9   :  { %4910 = vpow2.f32 %v4270_v7 }
 0xaca   :  { %4912 = vpow2.f32 %v4271_v12 }
 0xacb   :  { %4914 = vtanh.f32 %v3610_v25 }
 0xad2   :  { %v4909_v31 = vpop.eup %4908 }
 0xad3   :  { %v4911_v32 = vpop.eup %4910  ;;  %v3615_v33 = vadd.f32 1.0, %v4909_v31 }
 0xad4   :  { %v3621_v35 = vadd.f32 1.0, %v4911_v32  ;;  %v4913_v37 = vpop.eup %4912 }
 0xad5   :  { %4916 = vrcp.f32 %v3615_v33  ;;  %v4915_v40 = vpop.eup %4914  ;;  %v3628_v46 = vadd.f32 1.0, %v4913_v37 }
 0xad6   :  { %4918 = vrcp.f32 %v3621_v35 }
 0xad7   :  { %4920 = vrcp.f32 %v3628_v46 }
 0xadf   :  { %v4917_v43 = vpop.eup %4916 }
 0xae0   :  { %v4919_v45 = vpop.eup %4918  ;;  %v3632_v34 = vmul.f32 %v4917_v43, %v4915_v40 }
 0xae1   :  { %v3631_v36 = vmul.f32 %v4919_v45, %v3521_v13  ;;  %v4921_v50 = vpop.eup %4920 }
 0xae3   :  { %v3633_v48 = vadd.f32 %v3632_v34, %v3631_v36 }
 0xae5   :  { %4922 = vtanh.f32 %v3633_v48  ;;  %4274 = vst [vmem:[%s6341_s6 + $0x20] sm:$0xff] %v3633_v48 }
 0xaef   :  { %v4923_v9 = vpop.eup %4922 }
 0xaf0   :  { %v3635_v39 = vmul.f32 %v4923_v9, %v4921_v50 }
 0xaf2   :  { %4272 = vst [vmem:[%s6343_s4 + $0x8] sm:$0xff] %v3635_v39  ;;  %4273 = vst [vmem:[%s6342_s5 + $0x20] sm:$0xff] %v3635_v39 }

</bundles_post_ra>
